<compile_context>
chip_gen: v5e
topology: v5e:2x2
jax: 0.10.0
libtpu: 0.0.40
codegen_flags: <defaults>
</compile_context>

<pallas_src>
import functools

import jax
import jax.numpy as jnp
from jax.experimental import pallas as pl
from jax.experimental.pallas import tpu as pltpu

# ----------------------------- config (small, module-consistent) -------------
BYTES_NUM = 16          # sequence length (scaled down from 60; even & 8-aligned)
HIDDEN = 128            # self.channels == h_num == 128
FFN_HIDDEN = 256
NUM_HEADS = 4
NUM_LAYERS = 2
VOCAB = 258
MAX_LEN = 80
CLASS_NUM = 5
LN_EPS = 1e-5
LOGIT_PAD = 128         # classifier output padded lane-dense; real logits = first CLASS_NUM


# ----------------------------- in-kernel helpers ------------------------------
def _layernorm(x, g, b, eps):
    mu = jnp.mean(x, axis=-1, keepdims=True)
    xc = x - mu
    var = jnp.mean(xc * xc, axis=-1, keepdims=True)
    return xc * jax.lax.rsqrt(var + eps) * g + b


# ----------------------------- fused encoder layer ----------------------------
def _encoder_layer_kernel(x_ref, wqkv_ref, bqkv_ref, wo_ref, bo_ref,
                          ln1g_ref, ln1b_ref, w1_ref, b1_ref,
                          w2_ref, b2_ref, ln2g_ref, ln2b_ref,
                          o_ref, *, num_heads, scale, eps):
    x = x_ref[0]                                   # (S, H) f32, one batch element
    S, H = x.shape
    dh = H // num_heads

    # ---- fused Q|K|V projection (bf16 MXU inputs, f32 accumulation) ----
    qkv = jnp.dot(x.astype(jnp.bfloat16), wqkv_ref[...],
                  preferred_element_type=jnp.float32) + bqkv_ref[...]
    q = qkv[:, 0 * H:1 * H] * scale                # fold 1/sqrt(dh) into q
    k = qkv[:, 1 * H:2 * H]
    v = qkv[:, 2 * H:3 * H]

    # ---- all heads in one kernel; output projection accumulated per head ----
    proj = jnp.zeros((S, H), jnp.float32)
    for h in range(num_heads):
        qh = q[:, h * dh:(h + 1) * dh].astype(jnp.bfloat16)
        kh = k[:, h * dh:(h + 1) * dh].astype(jnp.bfloat16)
        vh = v[:, h * dh:(h + 1) * dh].astype(jnp.bfloat16)
        s = jax.lax.dot_general(qh, kh, (((1,), (1,)), ((), ())),
                                preferred_element_type=jnp.float32)     # (S, S)
        s = s - jnp.max(s, axis=-1, keepdims=True)                      # softmax in f32
        p = jnp.exp(s)
        p = p * pl.reciprocal(jnp.sum(p, axis=-1, keepdims=True), approx=True)
        head = jnp.dot(p.astype(jnp.bfloat16), vh,
                       preferred_element_type=jnp.float32)              # (S, dh)
        proj = proj + jnp.dot(head.astype(jnp.bfloat16),
                              wo_ref[pl.ds(h * dh, dh), :],
                              preferred_element_type=jnp.float32)       # (S, H)
    attn = proj + bo_ref[...]

    # ---- AddNorm 1 (f32 VPU math) ----
    x1 = _layernorm(x + attn, ln1g_ref[...], ln1b_ref[...], eps)

    # ---- PositionWiseFFN + AddNorm 2 ----
    h1 = jnp.dot(x1.astype(jnp.bfloat16), w1_ref[...],
                 preferred_element_type=jnp.float32) + b1_ref[...]
    h1 = jnp.maximum(h1, 0.0)
    h2 = jnp.dot(h1.astype(jnp.bfloat16), w2_ref[...],
                 preferred_element_type=jnp.float32) + b2_ref[...]
    o_ref[0] = _layernorm(x1 + h2, ln2g_ref[...], ln2b_ref[...], eps)


def encoder_layer(x, lyr):
    B, S, H = x.shape
    scale = 1.0 / ((H // NUM_HEADS) ** 0.5)

    def full(a):                                   # whole-array (VMEM-resident) weight
        return pl.BlockSpec(a.shape, lambda b: (0,) * a.ndim)

    return pl.pallas_call(
        functools.partial(_encoder_layer_kernel, num_heads=NUM_HEADS,
                          scale=scale, eps=LN_EPS),
        out_shape=jax.ShapeDtypeStruct((B, S, H), jnp.float32),
        grid=(B,),
        in_specs=[
            pl.BlockSpec((1, S, H), lambda b: (b, 0, 0)),
            full(lyr["wqkv"]), full(lyr["bqkv"]),
            full(lyr["wo"]), full(lyr["bo"]),
            full(lyr["ln1_g"]), full(lyr["ln1_b"]),
            full(lyr["w1"]), full(lyr["b1"]),
            full(lyr["w2"]), full(lyr["b2"]),
            full(lyr["ln2_g"]), full(lyr["ln2_b"]),
        ],
        out_specs=pl.BlockSpec((1, S, H), lambda b: (b, 0, 0)),
        compiler_params=pltpu.CompilerParams(dimension_semantics=("parallel",)),
    )(x, lyr["wqkv"], lyr["bqkv"], lyr["wo"], lyr["bo"],
      lyr["ln1_g"], lyr["ln1_b"], lyr["w1"], lyr["b1"],
      lyr["w2"], lyr["b2"], lyr["ln2_g"], lyr["ln2_b"])


# ----------------------- fused conv + relu + maxpool + classifier -------------
def _conv_pool_fc_kernel(x_ref, cw_ref, cb_ref, fw_ref, fb_ref, o_ref, *, cout):
    x = x_ref[0].astype(jnp.bfloat16)              # (L, Cin) channels-last
    L = x.shape[0]

    # Conv1d(k=3, 'same') as ONE wide matmul over the 3 taps (weights pre-concatenated).
    z = jnp.dot(x, cw_ref[...], preferred_element_type=jnp.float32)     # (L, 3*Cout)
    z0 = z[:, 0 * cout:1 * cout]     # tap multiplying x[l-1]
    z1 = z[:, 1 * cout:2 * cout]     # tap multiplying x[l]
    z2 = z[:, 2 * cout:3 * cout]     # tap multiplying x[l+1]

    row = jax.lax.broadcasted_iota(jnp.int32, (L, cout), 0)
    y = z1
    y = y + jnp.where(row > 0, pltpu.roll(z0, shift=1, axis=0), 0.0)         # += z0[l-1]
    y = y + jnp.where(row < L - 1, pltpu.roll(z2, shift=L - 1, axis=0), 0.0)  # += z2[l+1]
    y = jnp.maximum(y + cb_ref[...], 0.0)          # bias + ReLU

    # MaxPool1d(2,2): pairwise max via sublane roll, then pick even rows with a 0/1
    # selection matmul (avoids sublane-splitting reshapes / strided value slices).
    m = jnp.maximum(y, pltpu.roll(y, shift=L - 1, axis=0))     # m[l] = max(y[l], y[l+1])
    r = jax.lax.broadcasted_iota(jnp.int32, (L // 2, L), 0)
    c = jax.lax.broadcasted_iota(jnp.int32, (L // 2, L), 1)
    sel = (c == 2 * r).astype(jnp.float32)
    pooled = jnp.dot(sel, m, preferred_element_type=jnp.float32)          # (L//2, Cout)

    # Classifier. torch's flatten order (channel-major from NCL) is folded into the
    # fw layout (l, c, class); output is padded lane-dense to 128 columns.
    pooled_b = pooled.astype(jnp.bfloat16)
    acc = jnp.zeros((1, LOGIT_PAD), jnp.float32)
    for l in range(L // 2):
        acc = acc + jnp.dot(pooled_b[l:l + 1, :], fw_ref[l],
                            preferred_element_type=jnp.float32)
    o_ref[0] = acc + fb_ref[...]


def conv_pool_classifier(x, cw, cb, fw, fb):
    # x: (B, L, Cin); cw: (Cin, 3*Cout) bf16; cb: (1, Cout); fw: (L//2, Cout, 128) bf16
    B, L, Cin = x.shape
    cout = cb.shape[-1]
    return pl.pallas_call(
        functools.partial(_conv_pool_fc_kernel, cout=cout),
        out_shape=jax.ShapeDtypeStruct((B, 1, LOGIT_PAD), jnp.float32),
        grid=(B,),
        in_specs=[
            pl.BlockSpec((1, L, Cin), lambda b: (b, 0, 0)),
            pl.BlockSpec(cw.shape, lambda b: (0, 0)),
            pl.BlockSpec(cb.shape, lambda b: (0, 0)),
            pl.BlockSpec(fw.shape, lambda b: (0, 0, 0)),
            pl.BlockSpec(fb.shape, lambda b: (0, 0)),
        ],
        out_specs=pl.BlockSpec((1, 1, LOGIT_PAD), lambda b: (b, 0, 0)),
        compiler_params=pltpu.CompilerParams(dimension_semantics=("parallel",)),
    )(x, cw, cb, fw, fb)


# ----------------------------- parameters ------------------------------------
def init_params(key):
    def nrm(k, shape, scale=0.02):
        return scale * jax.random.normal(k, shape, jnp.float32)

    keys = iter(jax.random.split(key, 64))
    params = {
        "tok_emb": nrm(next(keys), (VOCAB, HIDDEN)),
        "seg_emb": nrm(next(keys), (2, HIDDEN)),
        "pos_emb": nrm(next(keys), (MAX_LEN, HIDDEN)),
        "layers": [],
    }
    for _ in range(NUM_LAYERS):
        params["layers"].append({
            # wq|wk|wv fused along the output dim; matmul weights stored bf16 (MXU),
            # biases / LayerNorm params kept f32 (VPU math stays f32 -> v5e-friendly).
            "wqkv": nrm(next(keys), (HIDDEN, 3 * HIDDEN)).astype(jnp.bfloat16),
            "bqkv": nrm(next(keys), (1, 3 * HIDDEN)),
            "wo": nrm(next(keys), (HIDDEN, HIDDEN)).astype(jnp.bfloat16),
            "bo": nrm(next(keys), (1, HIDDEN)),
            "ln1_g": jnp.ones((1, HIDDEN), jnp.float32),
            "ln1_b": jnp.zeros((1, HIDDEN), jnp.float32),
            "w1": nrm(next(keys), (HIDDEN, FFN_HIDDEN)).astype(jnp.bfloat16),
            "b1": nrm(next(keys), (1, FFN_HIDDEN)),
            "w2": nrm(next(keys), (FFN_HIDDEN, HIDDEN)).astype(jnp.bfloat16),
            "b2": nrm(next(keys), (1, HIDDEN)),
            "ln2_g": jnp.ones((1, HIDDEN), jnp.float32),
            "ln2_b": jnp.zeros((1, HIDDEN), jnp.float32),
        })

    cout = 2 * HIDDEN
    # Conv1d weight, taps concatenated along the output dim:
    #   conv_w[:, t*Cout + co] == torch_weight[co, :, t]  (tap 0 -> x[l-1], 1 -> x[l], 2 -> x[l+1])
    params["conv_w"] = nrm(next(keys), (HIDDEN, 3 * cout)).astype(jnp.bfloat16)
    params["conv_b"] = nrm(next(keys), (1, cout))

    # Classifier: torch layout (num_features, classNum) with feature = c*(L//2)+l
    # (flatten of NCL). Reorder to (l, c, class) and pad classes to 128 lanes.
    num_features = (BYTES_NUM // 2) * cout
    fc_w = nrm(next(keys), (num_features, CLASS_NUM))
    fc_w = fc_w.reshape(cout, BYTES_NUM // 2, CLASS_NUM).transpose(1, 0, 2)
    fc_w = jnp.pad(fc_w, ((0, 0), (0, 0), (0, LOGIT_PAD - CLASS_NUM)))
    params["fc_w"] = fc_w.astype(jnp.bfloat16)
    params["fc_b"] = jnp.pad(nrm(next(keys), (CLASS_NUM,)),
                             (0, LOGIT_PAD - CLASS_NUM)).reshape(1, LOGIT_PAD)
    return params


# ----------------------------- forward ---------------------------------------
def et_bert_forward(params, tokens):
    B, S = tokens.shape
    # BERT-style embeddings: token + segment(0) + positional (plain JAX gather + add).
    # TODO(synk): could also be folded into the first encoder-layer kernel via scalar prefetch.
    x = (params["tok_emb"][tokens]
         + params["seg_emb"][0][None, None, :]
         + params["pos_emb"][:S][None, :, :])

    for lyr in params["layers"]:
        x = encoder_layer(x, lyr)          # one fused pallas_call per encoder layer

    # cnn_pool + flatten (torch (C,L) order folded into fc_w) + liner_2, one fused call.
    logits = conv_pool_classifier(x, params["conv_w"], params["conv_b"],
                                  params["fc_w"], params["fc_b"])
    # nn.Dropout(0.1): eval-mode identity.
    return logits[:, 0, :CLASS_NUM]


# ----------------------------- main ------------------------------------------
if __name__ == "__main__":
    key = jax.random.PRNGKey(0)
    pkey, dkey = jax.random.split(key)
    params = init_params(pkey)
    tokens = jax.random.randint(dkey, (2, BYTES_NUM), 0, 256, dtype=jnp.int32)

    logits = jax.jit(et_bert_forward)(params, tokens)
    logits = jax.block_until_ready(logits)

    assert logits.shape == (2, CLASS_NUM), logits.shape
    assert bool(jnp.all(jnp.isfinite(logits)))
    print("KERNEL_OK")
</pallas_src>

<mosaic_0001>
module attributes {stable_mosaic.version = 11 : i64} {
  func.func @_conv_pool_fc_kernel(%arg0: i32, %arg1: memref<1x16x128xf32, #tpu.memory_space<vmem>>, %arg2: memref<128x768xbf16, #tpu.memory_space<vmem>>, %arg3: memref<1x256xf32, #tpu.memory_space<vmem>>, %arg4: memref<8x256x128xbf16, #tpu.memory_space<vmem>>, %arg5: memref<1x128xf32, #tpu.memory_space<vmem>>, %arg6: memref<1x1x128xf32, #tpu.memory_space<vmem>>) attributes {dimension_semantics = [#tpu.dimension_semantics<parallel>], iteration_bounds = array<i64: 2>, scalar_prefetch = 0 : i64, scratch_operands = 0 : i64, tpu.core_type = #tpu.core_type<tc>, window_params = [{transform_indices = @transform_0, window_bounds = array<i64: 1, 16, 128>}, {pipeline_mode = #tpu.pipeline_mode<synchronous>, transform_indices = @transform_1, window_bounds = array<i64: 128, 768>}, {pipeline_mode = #tpu.pipeline_mode<synchronous>, transform_indices = @transform_2, window_bounds = array<i64: 1, 256>}, {pipeline_mode = #tpu.pipeline_mode<synchronous>, transform_indices = @transform_3, window_bounds = array<i64: 8, 256, 128>}, {pipeline_mode = #tpu.pipeline_mode<synchronous>, transform_indices = @transform_4, window_bounds = array<i64: 1, 128>}, {transform_indices = @transform_5, window_bounds = array<i64: 1, 1, 128>}]} {
    %c0 = arith.constant 0 : index
    %c0_0 = arith.constant 0 : index
    %c0_1 = arith.constant 0 : index
    %0 = vector.load %arg1[%c0, %c0_0, %c0_1] : memref<1x16x128xf32, #tpu.memory_space<vmem>>, vector<1x16x128xf32>
    %1 = vector.shape_cast %0 : vector<1x16x128xf32> to vector<16x128xf32>
    %2 = arith.truncf %1 : vector<16x128xf32> to vector<16x128xbf16>
    %c0_2 = arith.constant 0 : index
    %c0_3 = arith.constant 0 : index
    %3 = vector.load %arg2[%c0_2, %c0_3] : memref<128x768xbf16, #tpu.memory_space<vmem>>, vector<128x768xbf16>
    %cst = arith.constant dense<0.000000e+00> : vector<16x768xf32>
    %4 = tpu.matmul %2, %3, %cst {dimension_numbers = #tpu.dot_dimension_numbers<[1], [0], [0], [1], [0, 0, 1, 1], [], []>} : vector<16x128xbf16>, vector<128x768xbf16>, vector<16x768xf32> -> vector<16x768xf32>
    %5 = vector.extract_strided_slice %4 {offsets = [0, 0], sizes = [16, 256], strides = [1, 1]} : vector<16x768xf32> to vector<16x256xf32>
    %6 = vector.extract_strided_slice %4 {offsets = [0, 256], sizes = [16, 256], strides = [1, 1]} : vector<16x768xf32> to vector<16x256xf32>
    %7 = vector.extract_strided_slice %4 {offsets = [0, 512], sizes = [16, 256], strides = [1, 1]} : vector<16x768xf32> to vector<16x256xf32>
    %8 = tpu.iota {dimensions = array<i32: 0>} : vector<16x256xi32>
    %c0_i32 = arith.constant 0 : i32
    %9 = vector.broadcast %c0_i32 : i32 to vector<16x256xi32>
    %10 = arith.cmpi sgt, %8, %9 : vector<16x256xi32>
    %c1_i32 = arith.constant 1 : i32
    %11 = tpu.dynamic_rotate %5 by %c1_i32 dim 0 : vector<16x256xf32>, i32 -> vector<16x256xf32>
    %cst_4 = arith.constant 0.000000e+00 : f32
    %12 = vector.broadcast %cst_4 : f32 to vector<16x256xf32>
    %13 = arith.select %10, %11, %12 : vector<16x256xi1>, vector<16x256xf32>
    %14 = arith.addf %6, %13 : vector<16x256xf32>
    %c15_i32 = arith.constant 15 : i32
    %15 = vector.broadcast %c15_i32 : i32 to vector<16x256xi32>
    %16 = arith.cmpi slt, %8, %15 : vector<16x256xi32>
    %c15_i32_5 = arith.constant 15 : i32
    %17 = tpu.dynamic_rotate %7 by %c15_i32_5 dim 0 : vector<16x256xf32>, i32 -> vector<16x256xf32>
    %cst_6 = arith.constant 0.000000e+00 : f32
    %18 = vector.broadcast %cst_6 : f32 to vector<16x256xf32>
    %19 = arith.select %16, %17, %18 : vector<16x256xi1>, vector<16x256xf32>
    %20 = arith.addf %14, %19 : vector<16x256xf32>
    %c0_7 = arith.constant 0 : index
    %c0_8 = arith.constant 0 : index
    %21 = vector.load %arg3[%c0_7, %c0_8] : memref<1x256xf32, #tpu.memory_space<vmem>>, vector<1x256xf32>
    %22 = vector.broadcast %21 : vector<1x256xf32> to vector<16x256xf32>
    %23 = arith.addf %20, %22 : vector<16x256xf32>
    %cst_9 = arith.constant 0.000000e+00 : f32
    %24 = vector.broadcast %cst_9 : f32 to vector<16x256xf32>
    %25 = arith.maximumf %23, %24 : vector<16x256xf32>
    %c15_i32_10 = arith.constant 15 : i32
    %26 = tpu.dynamic_rotate %25 by %c15_i32_10 dim 0 : vector<16x256xf32>, i32 -> vector<16x256xf32>
    %27 = arith.maximumf %25, %26 : vector<16x256xf32>
    %28 = tpu.iota {dimensions = array<i32: 0>} : vector<8x16xi32>
    %29 = tpu.iota {dimensions = array<i32: 1>} : vector<8x16xi32>
    %c2_i32 = arith.constant 2 : i32
    %30 = vector.broadcast %c2_i32 : i32 to vector<8x16xi32>
    %31 = arith.muli %30, %28 : vector<8x16xi32>
    %32 = arith.cmpi eq, %29, %31 : vector<8x16xi32>
    %33 = arith.extui %32 : vector<8x16xi1> to vector<8x16xi32>
    %34 = arith.sitofp %33 : vector<8x16xi32> to vector<8x16xf32>
    %cst_11 = arith.constant dense<0.000000e+00> : vector<8x256xf32>
    %35 = tpu.matmul %34, %27, %cst_11 {dimension_numbers = #tpu.dot_dimension_numbers<[1], [0], [0], [1], [0, 0, 1, 1], [], []>} : vector<8x16xf32>, vector<16x256xf32>, vector<8x256xf32> -> vector<8x256xf32>
    %36 = arith.truncf %35 : vector<8x256xf32> to vector<8x256xbf16>
    %cst_12 = arith.constant 0.000000e+00 : f32
    %37 = vector.broadcast %cst_12 : f32 to vector<1x128xf32>
    %38 = vector.extract_strided_slice %36 {offsets = [0, 0], sizes = [1, 256], strides = [1, 1]} : vector<8x256xbf16> to vector<1x256xbf16>
    %c0_13 = arith.constant 0 : index
    %c0_14 = arith.constant 0 : index
    %c0_15 = arith.constant 0 : index
    %39 = vector.load %arg4[%c0_13, %c0_14, %c0_15] : memref<8x256x128xbf16, #tpu.memory_space<vmem>>, vector<1x256x128xbf16>
    %40 = vector.shape_cast %39 : vector<1x256x128xbf16> to vector<256x128xbf16>
    %cst_16 = arith.constant dense<0.000000e+00> : vector<1x128xf32>
    %41 = tpu.matmul %38, %40, %cst_16 {dimension_numbers = #tpu.dot_dimension_numbers<[1], [0], [0], [1], [0, 0, 1, 1], [], []>} : vector<1x256xbf16>, vector<256x128xbf16>, vector<1x128xf32> -> vector<1x128xf32>
    %42 = arith.addf %37, %41 : vector<1x128xf32>
    %43 = vector.extract_strided_slice %36 {offsets = [1, 0], sizes = [1, 256], strides = [1, 1]} : vector<8x256xbf16> to vector<1x256xbf16>
    %c1 = arith.constant 1 : index
    %c0_17 = arith.constant 0 : index
    %c0_18 = arith.constant 0 : index
    %44 = vector.load %arg4[%c1, %c0_17, %c0_18] : memref<8x256x128xbf16, #tpu.memory_space<vmem>>, vector<1x256x128xbf16>
    %45 = vector.shape_cast %44 : vector<1x256x128xbf16> to vector<256x128xbf16>
    %cst_19 = arith.constant dense<0.000000e+00> : vector<1x128xf32>
    %46 = tpu.matmul %43, %45, %cst_19 {dimension_numbers = #tpu.dot_dimension_numbers<[1], [0], [0], [1], [0, 0, 1, 1], [], []>} : vector<1x256xbf16>, vector<256x128xbf16>, vector<1x128xf32> -> vector<1x128xf32>
    %47 = arith.addf %42, %46 : vector<1x128xf32>
    %48 = vector.extract_strided_slice %36 {offsets = [2, 0], sizes = [1, 256], strides = [1, 1]} : vector<8x256xbf16> to vector<1x256xbf16>
    %c2 = arith.constant 2 : index
    %c0_20 = arith.constant 0 : index
    %c0_21 = arith.constant 0 : index
    %49 = vector.load %arg4[%c2, %c0_20, %c0_21] : memref<8x256x128xbf16, #tpu.memory_space<vmem>>, vector<1x256x128xbf16>
    %50 = vector.shape_cast %49 : vector<1x256x128xbf16> to vector<256x128xbf16>
    %cst_22 = arith.constant dense<0.000000e+00> : vector<1x128xf32>
    %51 = tpu.matmul %48, %50, %cst_22 {dimension_numbers = #tpu.dot_dimension_numbers<[1], [0], [0], [1], [0, 0, 1, 1], [], []>} : vector<1x256xbf16>, vector<256x128xbf16>, vector<1x128xf32> -> vector<1x128xf32>
    %52 = arith.addf %47, %51 : vector<1x128xf32>
    %53 = vector.extract_strided_slice %36 {offsets = [3, 0], sizes = [1, 256], strides = [1, 1]} : vector<8x256xbf16> to vector<1x256xbf16>
    %c3 = arith.constant 3 : index
    %c0_23 = arith.constant 0 : index
    %c0_24 = arith.constant 0 : index
    %54 = vector.load %arg4[%c3, %c0_23, %c0_24] : memref<8x256x128xbf16, #tpu.memory_space<vmem>>, vector<1x256x128xbf16>
    %55 = vector.shape_cast %54 : vector<1x256x128xbf16> to vector<256x128xbf16>
    %cst_25 = arith.constant dense<0.000000e+00> : vector<1x128xf32>
    %56 = tpu.matmul %53, %55, %cst_25 {dimension_numbers = #tpu.dot_dimension_numbers<[1], [0], [0], [1], [0, 0, 1, 1], [], []>} : vector<1x256xbf16>, vector<256x128xbf16>, vector<1x128xf32> -> vector<1x128xf32>
    %57 = arith.addf %52, %56 : vector<1x128xf32>
    %58 = vector.extract_strided_slice %36 {offsets = [4, 0], sizes = [1, 256], strides = [1, 1]} : vector<8x256xbf16> to vector<1x256xbf16>
    %c4 = arith.constant 4 : index
    %c0_26 = arith.constant 0 : index
    %c0_27 = arith.constant 0 : index
    %59 = vector.load %arg4[%c4, %c0_26, %c0_27] : memref<8x256x128xbf16, #tpu.memory_space<vmem>>, vector<1x256x128xbf16>
    %60 = vector.shape_cast %59 : vector<1x256x128xbf16> to vector<256x128xbf16>
    %cst_28 = arith.constant dense<0.000000e+00> : vector<1x128xf32>
    %61 = tpu.matmul %58, %60, %cst_28 {dimension_numbers = #tpu.dot_dimension_numbers<[1], [0], [0], [1], [0, 0, 1, 1], [], []>} : vector<1x256xbf16>, vector<256x128xbf16>, vector<1x128xf32> -> vector<1x128xf32>
    %62 = arith.addf %57, %61 : vector<1x128xf32>
    %63 = vector.extract_strided_slice %36 {offsets = [5, 0], sizes = [1, 256], strides = [1, 1]} : vector<8x256xbf16> to vector<1x256xbf16>
    %c5 = arith.constant 5 : index
    %c0_29 = arith.constant 0 : index
    %c0_30 = arith.constant 0 : index
    %64 = vector.load %arg4[%c5, %c0_29, %c0_30] : memref<8x256x128xbf16, #tpu.memory_space<vmem>>, vector<1x256x128xbf16>
    %65 = vector.shape_cast %64 : vector<1x256x128xbf16> to vector<256x128xbf16>
    %cst_31 = arith.constant dense<0.000000e+00> : vector<1x128xf32>
    %66 = tpu.matmul %63, %65, %cst_31 {dimension_numbers = #tpu.dot_dimension_numbers<[1], [0], [0], [1], [0, 0, 1, 1], [], []>} : vector<1x256xbf16>, vector<256x128xbf16>, vector<1x128xf32> -> vector<1x128xf32>
    %67 = arith.addf %62, %66 : vector<1x128xf32>
    %68 = vector.extract_strided_slice %36 {offsets = [6, 0], sizes = [1, 256], strides = [1, 1]} : vector<8x256xbf16> to vector<1x256xbf16>
    %c6 = arith.constant 6 : index
    %c0_32 = arith.constant 0 : index
    %c0_33 = arith.constant 0 : index
    %69 = vector.load %arg4[%c6, %c0_32, %c0_33] : memref<8x256x128xbf16, #tpu.memory_space<vmem>>, vector<1x256x128xbf16>
    %70 = vector.shape_cast %69 : vector<1x256x128xbf16> to vector<256x128xbf16>
    %cst_34 = arith.constant dense<0.000000e+00> : vector<1x128xf32>
    %71 = tpu.matmul %68, %70, %cst_34 {dimension_numbers = #tpu.dot_dimension_numbers<[1], [0], [0], [1], [0, 0, 1, 1], [], []>} : vector<1x256xbf16>, vector<256x128xbf16>, vector<1x128xf32> -> vector<1x128xf32>
    %72 = arith.addf %67, %71 : vector<1x128xf32>
    %73 = vector.extract_strided_slice %36 {offsets = [7, 0], sizes = [1, 256], strides = [1, 1]} : vector<8x256xbf16> to vector<1x256xbf16>
    %c7 = arith.constant 7 : index
    %c0_35 = arith.constant 0 : index
    %c0_36 = arith.constant 0 : index
    %74 = vector.load %arg4[%c7, %c0_35, %c0_36] : memref<8x256x128xbf16, #tpu.memory_space<vmem>>, vector<1x256x128xbf16>
    %75 = vector.shape_cast %74 : vector<1x256x128xbf16> to vector<256x128xbf16>
    %cst_37 = arith.constant dense<0.000000e+00> : vector<1x128xf32>
    %76 = tpu.matmul %73, %75, %cst_37 {dimension_numbers = #tpu.dot_dimension_numbers<[1], [0], [0], [1], [0, 0, 1, 1], [], []>} : vector<1x256xbf16>, vector<256x128xbf16>, vector<1x128xf32> -> vector<1x128xf32>
    %77 = arith.addf %72, %76 : vector<1x128xf32>
    %c0_38 = arith.constant 0 : index
    %c0_39 = arith.constant 0 : index
    %78 = vector.load %arg5[%c0_38, %c0_39] : memref<1x128xf32, #tpu.memory_space<vmem>>, vector<1x128xf32>
    %79 = arith.addf %77, %78 : vector<1x128xf32>
    %c0_40 = arith.constant 0 : index
    %c0_41 = arith.constant 0 : index
    %c0_42 = arith.constant 0 : index
    %80 = vector.load %arg6[%c0_40, %c0_41, %c0_42] : memref<1x1x128xf32, #tpu.memory_space<vmem>>, vector<1x1x128xf32>
    %81 = vector.shape_cast %80 : vector<1x1x128xf32> to vector<1x128xf32>
    %82 = vector.shape_cast %79 : vector<1x128xf32> to vector<1x1x128xf32>
    tpu.vector_store %arg6[%c0_40, %c0_41, %c0_42], %82 {strides = array<i32>} : memref<1x1x128xf32, #tpu.memory_space<vmem>>, vector<1x1x128xf32>,
    return
  }
  func.func @transform_0(%arg0: i32) -> (i32, i32, i32) {
    %c0_i32 = arith.constant 0 : i32
    %c0_i32_0 = arith.constant 0 : i32
    %c0_i32_1 = arith.constant 0 : i32
    return %arg0, %c0_i32, %c0_i32_0 : i32, i32, i32
  }
  func.func @transform_1(%arg0: i32) -> (i32, i32) {
    %c0_i32 = arith.constant 0 : i32
    %c0_i32_0 = arith.constant 0 : i32
    %c0_i32_1 = arith.constant 0 : i32
    return %c0_i32, %c0_i32_0 : i32, i32
  }
  func.func @transform_2(%arg0: i32) -> (i32, i32) {
    %c0_i32 = arith.constant 0 : i32
    %c0_i32_0 = arith.constant 0 : i32
    %c0_i32_1 = arith.constant 0 : i32
    return %c0_i32, %c0_i32_0 : i32, i32
  }
  func.func @transform_3(%arg0: i32) -> (i32, i32, i32) {
    %c0_i32 = arith.constant 0 : i32
    %c0_i32_0 = arith.constant 0 : i32
    %c0_i32_1 = arith.constant 0 : i32
    %c0_i32_2 = arith.constant 0 : i32
    return %c0_i32, %c0_i32_0, %c0_i32_1 : i32, i32, i32
  }
  func.func @transform_4(%arg0: i32) -> (i32, i32) {
    %c0_i32 = arith.constant 0 : i32
    %c0_i32_0 = arith.constant 0 : i32
    %c0_i32_1 = arith.constant 0 : i32
    return %c0_i32, %c0_i32_0 : i32, i32
  }
  func.func @transform_5(%arg0: i32) -> (i32, i32, i32) {
    %c0_i32 = arith.constant 0 : i32
    %c0_i32_0 = arith.constant 0 : i32
    %c0_i32_1 = arith.constant 0 : i32
    return %arg0, %c0_i32, %c0_i32_0 : i32, i32, i32
  }
}

module attributes {stable_mosaic.version = 11 : i64} {
  func.func @_encoder_layer_kernel(%arg0: i32, %arg1: memref<1x16x128xf32, #tpu.memory_space<vmem>>, %arg2: memref<128x384xbf16, #tpu.memory_space<vmem>>, %arg3: memref<1x384xf32, #tpu.memory_space<vmem>>, %arg4: memref<128x128xbf16, #tpu.memory_space<vmem>>, %arg5: memref<1x128xf32, #tpu.memory_space<vmem>>, %arg6: memref<1x128xf32, #tpu.memory_space<vmem>>, %arg7: memref<1x128xf32, #tpu.memory_space<vmem>>, %arg8: memref<128x256xbf16, #tpu.memory_space<vmem>>, %arg9: memref<1x256xf32, #tpu.memory_space<vmem>>, %arg10: memref<256x128xbf16, #tpu.memory_space<vmem>>, %arg11: memref<1x128xf32, #tpu.memory_space<vmem>>, %arg12: memref<1x128xf32, #tpu.memory_space<vmem>>, %arg13: memref<1x128xf32, #tpu.memory_space<vmem>>, %arg14: memref<1x16x128xf32, #tpu.memory_space<vmem>>) attributes {dimension_semantics = [#tpu.dimension_semantics<parallel>], iteration_bounds = array<i64: 2>, scalar_prefetch = 0 : i64, scratch_operands = 0 : i64, tpu.core_type = #tpu.core_type<tc>, window_params = [{transform_indices = @transform_0, window_bounds = array<i64: 1, 16, 128>}, {pipeline_mode = #tpu.pipeline_mode<synchronous>, transform_indices = @transform_1, window_bounds = array<i64: 128, 384>}, {pipeline_mode = #tpu.pipeline_mode<synchronous>, transform_indices = @transform_2, window_bounds = array<i64: 1, 384>}, {pipeline_mode = #tpu.pipeline_mode<synchronous>, transform_indices = @transform_3, window_bounds = array<i64: 128, 128>}, {pipeline_mode = #tpu.pipeline_mode<synchronous>, transform_indices = @transform_4, window_bounds = array<i64: 1, 128>}, {pipeline_mode = #tpu.pipeline_mode<synchronous>, transform_indices = @transform_5, window_bounds = array<i64: 1, 128>}, {pipeline_mode = #tpu.pipeline_mode<synchronous>, transform_indices = @transform_6, window_bounds = array<i64: 1, 128>}, {pipeline_mode = #tpu.pipeline_mode<synchronous>, transform_indices = @transform_7, window_bounds = array<i64: 128, 256>}, {pipeline_mode = #tpu.pipeline_mode<synchronous>, transform_indices = @transform_8, window_bounds = array<i64: 1, 256>}, {pipeline_mode = #tpu.pipeline_mode<synchronous>, transform_indices = @transform_9, window_bounds = array<i64: 256, 128>}, {pipeline_mode = #tpu.pipeline_mode<synchronous>, transform_indices = @transform_10, window_bounds = array<i64: 1, 128>}, {pipeline_mode = #tpu.pipeline_mode<synchronous>, transform_indices = @transform_11, window_bounds = array<i64: 1, 128>}, {pipeline_mode = #tpu.pipeline_mode<synchronous>, transform_indices = @transform_12, window_bounds = array<i64: 1, 128>}, {transform_indices = @transform_13, window_bounds = array<i64: 1, 16, 128>}]} {
    %c0 = arith.constant 0 : index
    %c0_0 = arith.constant 0 : index
    %c0_1 = arith.constant 0 : index
    %0 = vector.load %arg1[%c0, %c0_0, %c0_1] : memref<1x16x128xf32, #tpu.memory_space<vmem>>, vector<1x16x128xf32>
    %1 = vector.shape_cast %0 : vector<1x16x128xf32> to vector<16x128xf32>
    %2 = arith.truncf %1 : vector<16x128xf32> to vector<16x128xbf16>
    %c0_2 = arith.constant 0 : index
    %c0_3 = arith.constant 0 : index
    %3 = vector.load %arg2[%c0_2, %c0_3] : memref<128x384xbf16, #tpu.memory_space<vmem>>, vector<128x384xbf16>
    %cst = arith.constant dense<0.000000e+00> : vector<16x384xf32>
    %4 = tpu.matmul %2, %3, %cst {dimension_numbers = #tpu.dot_dimension_numbers<[1], [0], [0], [1], [0, 0, 1, 1], [], []>} : vector<16x128xbf16>, vector<128x384xbf16>, vector<16x384xf32> -> vector<16x384xf32>
    %c0_4 = arith.constant 0 : index
    %c0_5 = arith.constant 0 : index
    %5 = vector.load %arg3[%c0_4, %c0_5] : memref<1x384xf32, #tpu.memory_space<vmem>>, vector<1x384xf32>
    %6 = vector.broadcast %5 : vector<1x384xf32> to vector<16x384xf32>
    %7 = arith.addf %4, %6 : vector<16x384xf32>
    %8 = vector.extract_strided_slice %7 {offsets = [0, 0], sizes = [16, 128], strides = [1, 1]} : vector<16x384xf32> to vector<16x128xf32>
    %cst_6 = arith.constant 0.176776692 : f32
    %9 = vector.broadcast %cst_6 : f32 to vector<16x128xf32>
    %10 = arith.mulf %8, %9 : vector<16x128xf32>
    %11 = vector.extract_strided_slice %7 {offsets = [0, 128], sizes = [16, 128], strides = [1, 1]} : vector<16x384xf32> to vector<16x128xf32>
    %12 = vector.extract_strided_slice %7 {offsets = [0, 256], sizes = [16, 128], strides = [1, 1]} : vector<16x384xf32> to vector<16x128xf32>
    %cst_7 = arith.constant 0.000000e+00 : f32
    %13 = vector.broadcast %cst_7 : f32 to vector<16x128xf32>
    %14 = vector.extract_strided_slice %10 {offsets = [0, 0], sizes = [16, 32], strides = [1, 1]} : vector<16x128xf32> to vector<16x32xf32>
    %15 = arith.truncf %14 : vector<16x32xf32> to vector<16x32xbf16>
    %16 = vector.extract_strided_slice %11 {offsets = [0, 0], sizes = [16, 32], strides = [1, 1]} : vector<16x128xf32> to vector<16x32xf32>
    %17 = arith.truncf %16 : vector<16x32xf32> to vector<16x32xbf16>
    %18 = vector.extract_strided_slice %12 {offsets = [0, 0], sizes = [16, 32], strides = [1, 1]} : vector<16x128xf32> to vector<16x32xf32>
    %19 = arith.truncf %18 : vector<16x32xf32> to vector<16x32xbf16>
    %cst_8 = arith.constant dense<0.000000e+00> : vector<16x16xf32>
    %20 = tpu.matmul %15, %17, %cst_8 {dimension_numbers = #tpu.dot_dimension_numbers<[1], [1], [0], [0], [0, 0, 1, 0], [], []>} : vector<16x32xbf16>, vector<16x32xbf16>, vector<16x16xf32> -> vector<16x16xf32>
    %cst_9 = arith.constant dense<0xFF800000> : vector<16xf32>
    %21 = vector.multi_reduction <maximumf>, %20, %cst_9 [1] : vector<16x16xf32> to vector<16xf32>
    %22 = vector.shape_cast %21 : vector<16xf32> to vector<16x1xf32>
    %23 = vector.broadcast %22 : vector<16x1xf32> to vector<16x16xf32>
    %24 = arith.subf %20, %23 : vector<16x16xf32>
    %25 = math.exp %24 : vector<16x16xf32>
    %cst_10 = arith.constant dense<0.000000e+00> : vector<16xf32>
    %26 = vector.multi_reduction <add>, %25, %cst_10 [1] : vector<16x16xf32> to vector<16xf32>
    %27 = vector.shape_cast %26 : vector<16xf32> to vector<16x1xf32>
    %28 = tpu.reciprocal %27 {approx = true} : vector<16x1xf32> -> vector<16x1xf32>
    %29 = vector.broadcast %28 : vector<16x1xf32> to vector<16x16xf32>
    %30 = arith.mulf %25, %29 : vector<16x16xf32>
    %31 = arith.truncf %30 : vector<16x16xf32> to vector<16x16xbf16>
    %cst_11 = arith.constant dense<0.000000e+00> : vector<16x32xf32>
    %32 = tpu.matmul %31, %19, %cst_11 {dimension_numbers = #tpu.dot_dimension_numbers<[1], [0], [0], [1], [0, 0, 1, 1], [], []>} : vector<16x16xbf16>, vector<16x32xbf16>, vector<16x32xf32> -> vector<16x32xf32>
    %33 = arith.truncf %32 : vector<16x32xf32> to vector<16x32xbf16>
    %c0_12 = arith.constant 0 : index
    %c0_13 = arith.constant 0 : index
    %34 = vector.load %arg4[%c0_12, %c0_13] : memref<128x128xbf16, #tpu.memory_space<vmem>>, vector<32x128xbf16>
    %cst_14 = arith.constant dense<0.000000e+00> : vector<16x128xf32>
    %35 = tpu.matmul %33, %34, %cst_14 {dimension_numbers = #tpu.dot_dimension_numbers<[1], [0], [0], [1], [0, 0, 1, 1], [], []>} : vector<16x32xbf16>, vector<32x128xbf16>, vector<16x128xf32> -> vector<16x128xf32>
    %36 = arith.addf %13, %35 : vector<16x128xf32>
    %37 = vector.extract_strided_slice %10 {offsets = [0, 32], sizes = [16, 32], strides = [1, 1]} : vector<16x128xf32> to vector<16x32xf32>
    %38 = arith.truncf %37 : vector<16x32xf32> to vector<16x32xbf16>
    %39 = vector.extract_strided_slice %11 {offsets = [0, 32], sizes = [16, 32], strides = [1, 1]} : vector<16x128xf32> to vector<16x32xf32>
    %40 = arith.truncf %39 : vector<16x32xf32> to vector<16x32xbf16>
    %41 = vector.extract_strided_slice %12 {offsets = [0, 32], sizes = [16, 32], strides = [1, 1]} : vector<16x128xf32> to vector<16x32xf32>
    %42 = arith.truncf %41 : vector<16x32xf32> to vector<16x32xbf16>
    %cst_15 = arith.constant dense<0.000000e+00> : vector<16x16xf32>
    %43 = tpu.matmul %38, %40, %cst_15 {dimension_numbers = #tpu.dot_dimension_numbers<[1], [1], [0], [0], [0, 0, 1, 0], [], []>} : vector<16x32xbf16>, vector<16x32xbf16>, vector<16x16xf32> -> vector<16x16xf32>
    %cst_16 = arith.constant dense<0xFF800000> : vector<16xf32>
    %44 = vector.multi_reduction <maximumf>, %43, %cst_16 [1] : vector<16x16xf32> to vector<16xf32>
    %45 = vector.shape_cast %44 : vector<16xf32> to vector<16x1xf32>
    %46 = vector.broadcast %45 : vector<16x1xf32> to vector<16x16xf32>
    %47 = arith.subf %43, %46 : vector<16x16xf32>
    %48 = math.exp %47 : vector<16x16xf32>
    %cst_17 = arith.constant dense<0.000000e+00> : vector<16xf32>
    %49 = vector.multi_reduction <add>, %48, %cst_17 [1] : vector<16x16xf32> to vector<16xf32>
    %50 = vector.shape_cast %49 : vector<16xf32> to vector<16x1xf32>
    %51 = tpu.reciprocal %50 {approx = true} : vector<16x1xf32> -> vector<16x1xf32>
    %52 = vector.broadcast %51 : vector<16x1xf32> to vector<16x16xf32>
    %53 = arith.mulf %48, %52 : vector<16x16xf32>
    %54 = arith.truncf %53 : vector<16x16xf32> to vector<16x16xbf16>
    %cst_18 = arith.constant dense<0.000000e+00> : vector<16x32xf32>
    %55 = tpu.matmul %54, %42, %cst_18 {dimension_numbers = #tpu.dot_dimension_numbers<[1], [0], [0], [1], [0, 0, 1, 1], [], []>} : vector<16x16xbf16>, vector<16x32xbf16>, vector<16x32xf32> -> vector<16x32xf32>
    %56 = arith.truncf %55 : vector<16x32xf32> to vector<16x32xbf16>
    %c32 = arith.constant 32 : index
    %c0_19 = arith.constant 0 : index
    %57 = vector.load %arg4[%c32, %c0_19] : memref<128x128xbf16, #tpu.memory_space<vmem>>, vector<32x128xbf16>
    %cst_20 = arith.constant dense<0.000000e+00> : vector<16x128xf32>
    %58 = tpu.matmul %56, %57, %cst_20 {dimension_numbers = #tpu.dot_dimension_numbers<[1], [0], [0], [1], [0, 0, 1, 1], [], []>} : vector<16x32xbf16>, vector<32x128xbf16>, vector<16x128xf32> -> vector<16x128xf32>
    %59 = arith.addf %36, %58 : vector<16x128xf32>
    %60 = vector.extract_strided_slice %10 {offsets = [0, 64], sizes = [16, 32], strides = [1, 1]} : vector<16x128xf32> to vector<16x32xf32>
    %61 = arith.truncf %60 : vector<16x32xf32> to vector<16x32xbf16>
    %62 = vector.extract_strided_slice %11 {offsets = [0, 64], sizes = [16, 32], strides = [1, 1]} : vector<16x128xf32> to vector<16x32xf32>
    %63 = arith.truncf %62 : vector<16x32xf32> to vector<16x32xbf16>
    %64 = vector.extract_strided_slice %12 {offsets = [0, 64], sizes = [16, 32], strides = [1, 1]} : vector<16x128xf32> to vector<16x32xf32>
    %65 = arith.truncf %64 : vector<16x32xf32> to vector<16x32xbf16>
    %cst_21 = arith.constant dense<0.000000e+00> : vector<16x16xf32>
    %66 = tpu.matmul %61, %63, %cst_21 {dimension_numbers = #tpu.dot_dimension_numbers<[1], [1], [0], [0], [0, 0, 1, 0], [], []>} : vector<16x32xbf16>, vector<16x32xbf16>, vector<16x16xf32> -> vector<16x16xf32>
    %cst_22 = arith.constant dense<0xFF800000> : vector<16xf32>
    %67 = vector.multi_reduction <maximumf>, %66, %cst_22 [1] : vector<16x16xf32> to vector<16xf32>
    %68 = vector.shape_cast %67 : vector<16xf32> to vector<16x1xf32>
    %69 = vector.broadcast %68 : vector<16x1xf32> to vector<16x16xf32>
    %70 = arith.subf %66, %69 : vector<16x16xf32>
    %71 = math.exp %70 : vector<16x16xf32>
    %cst_23 = arith.constant dense<0.000000e+00> : vector<16xf32>
    %72 = vector.multi_reduction <add>, %71, %cst_23 [1] : vector<16x16xf32> to vector<16xf32>
    %73 = vector.shape_cast %72 : vector<16xf32> to vector<16x1xf32>
    %74 = tpu.reciprocal %73 {approx = true} : vector<16x1xf32> -> vector<16x1xf32>
    %75 = vector.broadcast %74 : vector<16x1xf32> to vector<16x16xf32>
    %76 = arith.mulf %71, %75 : vector<16x16xf32>
    %77 = arith.truncf %76 : vector<16x16xf32> to vector<16x16xbf16>
    %cst_24 = arith.constant dense<0.000000e+00> : vector<16x32xf32>
    %78 = tpu.matmul %77, %65, %cst_24 {dimension_numbers = #tpu.dot_dimension_numbers<[1], [0], [0], [1], [0, 0, 1, 1], [], []>} : vector<16x16xbf16>, vector<16x32xbf16>, vector<16x32xf32> -> vector<16x32xf32>
    %79 = arith.truncf %78 : vector<16x32xf32> to vector<16x32xbf16>
    %c64 = arith.constant 64 : index
    %c0_25 = arith.constant 0 : index
    %80 = vector.load %arg4[%c64, %c0_25] : memref<128x128xbf16, #tpu.memory_space<vmem>>, vector<32x128xbf16>
    %cst_26 = arith.constant dense<0.000000e+00> : vector<16x128xf32>
    %81 = tpu.matmul %79, %80, %cst_26 {dimension_numbers = #tpu.dot_dimension_numbers<[1], [0], [0], [1], [0, 0, 1, 1], [], []>} : vector<16x32xbf16>, vector<32x128xbf16>, vector<16x128xf32> -> vector<16x128xf32>
    %82 = arith.addf %59, %81 : vector<16x128xf32>
    %83 = vector.extract_strided_slice %10 {offsets = [0, 96], sizes = [16, 32], strides = [1, 1]} : vector<16x128xf32> to vector<16x32xf32>
    %84 = arith.truncf %83 : vector<16x32xf32> to vector<16x32xbf16>
    %85 = vector.extract_strided_slice %11 {offsets = [0, 96], sizes = [16, 32], strides = [1, 1]} : vector<16x128xf32> to vector<16x32xf32>
    %86 = arith.truncf %85 : vector<16x32xf32> to vector<16x32xbf16>
    %87 = vector.extract_strided_slice %12 {offsets = [0, 96], sizes = [16, 32], strides = [1, 1]} : vector<16x128xf32> to vector<16x32xf32>
    %88 = arith.truncf %87 : vector<16x32xf32> to vector<16x32xbf16>
    %cst_27 = arith.constant dense<0.000000e+00> : vector<16x16xf32>
    %89 = tpu.matmul %84, %86, %cst_27 {dimension_numbers = #tpu.dot_dimension_numbers<[1], [1], [0], [0], [0, 0, 1, 0], [], []>} : vector<16x32xbf16>, vector<16x32xbf16>, vector<16x16xf32> -> vector<16x16xf32>
    %cst_28 = arith.constant dense<0xFF800000> : vector<16xf32>
    %90 = vector.multi_reduction <maximumf>, %89, %cst_28 [1] : vector<16x16xf32> to vector<16xf32>
    %91 = vector.shape_cast %90 : vector<16xf32> to vector<16x1xf32>
    %92 = vector.broadcast %91 : vector<16x1xf32> to vector<16x16xf32>
    %93 = arith.subf %89, %92 : vector<16x16xf32>
    %94 = math.exp %93 : vector<16x16xf32>
    %cst_29 = arith.constant dense<0.000000e+00> : vector<16xf32>
    %95 = vector.multi_reduction <add>, %94, %cst_29 [1] : vector<16x16xf32> to vector<16xf32>
    %96 = vector.shape_cast %95 : vector<16xf32> to vector<16x1xf32>
    %97 = tpu.reciprocal %96 {approx = true} : vector<16x1xf32> -> vector<16x1xf32>
    %98 = vector.broadcast %97 : vector<16x1xf32> to vector<16x16xf32>
    %99 = arith.mulf %94, %98 : vector<16x16xf32>
    %100 = arith.truncf %99 : vector<16x16xf32> to vector<16x16xbf16>
    %cst_30 = arith.constant dense<0.000000e+00> : vector<16x32xf32>
    %101 = tpu.matmul %100, %88, %cst_30 {dimension_numbers = #tpu.dot_dimension_numbers<[1], [0], [0], [1], [0, 0, 1, 1], [], []>} : vector<16x16xbf16>, vector<16x32xbf16>, vector<16x32xf32> -> vector<16x32xf32>
    %102 = arith.truncf %101 : vector<16x32xf32> to vector<16x32xbf16>
    %c96 = arith.constant 96 : index
    %c0_31 = arith.constant 0 : index
    %103 = vector.load %arg4[%c96, %c0_31] : memref<128x128xbf16, #tpu.memory_space<vmem>>, vector<32x128xbf16>
    %cst_32 = arith.constant dense<0.000000e+00> : vector<16x128xf32>
    %104 = tpu.matmul %102, %103, %cst_32 {dimension_numbers = #tpu.dot_dimension_numbers<[1], [0], [0], [1], [0, 0, 1, 1], [], []>} : vector<16x32xbf16>, vector<32x128xbf16>, vector<16x128xf32> -> vector<16x128xf32>
    %105 = arith.addf %82, %104 : vector<16x128xf32>
    %c0_33 = arith.constant 0 : index
    %c0_34 = arith.constant 0 : index
    %106 = vector.load %arg5[%c0_33, %c0_34] : memref<1x128xf32, #tpu.memory_space<vmem>>, vector<1x128xf32>
    %107 = vector.broadcast %106 : vector<1x128xf32> to vector<16x128xf32>
    %108 = arith.addf %105, %107 : vector<16x128xf32>
    %109 = arith.addf %1, %108 : vector<16x128xf32>
    %c0_35 = arith.constant 0 : index
    %c0_36 = arith.constant 0 : index
    %110 = vector.load %arg6[%c0_35, %c0_36] : memref<1x128xf32, #tpu.memory_space<vmem>>, vector<1x128xf32>
    %c0_37 = arith.constant 0 : index
    %c0_38 = arith.constant 0 : index
    %111 = vector.load %arg7[%c0_37, %c0_38] : memref<1x128xf32, #tpu.memory_space<vmem>>, vector<1x128xf32>
    %cst_39 = arith.constant dense<0.000000e+00> : vector<16xf32>
    %112 = vector.multi_reduction <add>, %109, %cst_39 [1] : vector<16x128xf32> to vector<16xf32>
    %113 = vector.shape_cast %112 : vector<16xf32> to vector<16x1xf32>
    %cst_40 = arith.constant 1.280000e+02 : f32
    %114 = vector.broadcast %cst_40 : f32 to vector<16x1xf32>
    %115 = arith.divf %113, %114 : vector<16x1xf32>
    %116 = vector.broadcast %115 : vector<16x1xf32> to vector<16x128xf32>
    %117 = arith.subf %109, %116 : vector<16x128xf32>
    %118 = arith.mulf %117, %117 : vector<16x128xf32>
    %cst_41 = arith.constant dense<0.000000e+00> : vector<16xf32>
    %119 = vector.multi_reduction <add>, %118, %cst_41 [1] : vector<16x128xf32> to vector<16xf32>
    %120 = vector.shape_cast %119 : vector<16xf32> to vector<16x1xf32>
    %cst_42 = arith.constant 1.280000e+02 : f32
    %121 = vector.broadcast %cst_42 : f32 to vector<16x1xf32>
    %122 = arith.divf %120, %121 : vector<16x1xf32>
    %cst_43 = arith.constant 9.99999974E-6 : f32
    %123 = vector.broadcast %cst_43 : f32 to vector<16x1xf32>
    %124 = arith.addf %122, %123 : vector<16x1xf32>
    %125 = math.rsqrt %124 : vector<16x1xf32>
    %126 = vector.broadcast %125 : vector<16x1xf32> to vector<16x128xf32>
    %127 = arith.mulf %117, %126 : vector<16x128xf32>
    %128 = vector.broadcast %110 : vector<1x128xf32> to vector<16x128xf32>
    %129 = arith.mulf %127, %128 : vector<16x128xf32>
    %130 = vector.broadcast %111 : vector<1x128xf32> to vector<16x128xf32>
    %131 = arith.addf %129, %130 : vector<16x128xf32>
    %132 = arith.truncf %131 : vector<16x128xf32> to vector<16x128xbf16>
    %c0_44 = arith.constant 0 : index
    %c0_45 = arith.constant 0 : index
    %133 = vector.load %arg8[%c0_44, %c0_45] : memref<128x256xbf16, #tpu.memory_space<vmem>>, vector<128x256xbf16>
    %cst_46 = arith.constant dense<0.000000e+00> : vector<16x256xf32>
    %134 = tpu.matmul %132, %133, %cst_46 {dimension_numbers = #tpu.dot_dimension_numbers<[1], [0], [0], [1], [0, 0, 1, 1], [], []>} : vector<16x128xbf16>, vector<128x256xbf16>, vector<16x256xf32> -> vector<16x256xf32>
    %c0_47 = arith.constant 0 : index
    %c0_48 = arith.constant 0 : index
    %135 = vector.load %arg9[%c0_47, %c0_48] : memref<1x256xf32, #tpu.memory_space<vmem>>, vector<1x256xf32>
    %136 = vector.broadcast %135 : vector<1x256xf32> to vector<16x256xf32>
    %137 = arith.addf %134, %136 : vector<16x256xf32>
    %cst_49 = arith.constant 0.000000e+00 : f32
    %138 = vector.broadcast %cst_49 : f32 to vector<16x256xf32>
    %139 = arith.maximumf %137, %138 : vector<16x256xf32>
    %140 = arith.truncf %139 : vector<16x256xf32> to vector<16x256xbf16>
    %c0_50 = arith.constant 0 : index
    %c0_51 = arith.constant 0 : index
    %141 = vector.load %arg10[%c0_50, %c0_51] : memref<256x128xbf16, #tpu.memory_space<vmem>>, vector<256x128xbf16>
    %cst_52 = arith.constant dense<0.000000e+00> : vector<16x128xf32>
    %142 = tpu.matmul %140, %141, %cst_52 {dimension_numbers = #tpu.dot_dimension_numbers<[1], [0], [0], [1], [0, 0, 1, 1], [], []>} : vector<16x256xbf16>, vector<256x128xbf16>, vector<16x128xf32> -> vector<16x128xf32>
    %c0_53 = arith.constant 0 : index
    %c0_54 = arith.constant 0 : index
    %143 = vector.load %arg11[%c0_53, %c0_54] : memref<1x128xf32, #tpu.memory_space<vmem>>, vector<1x128xf32>
    %144 = vector.broadcast %143 : vector<1x128xf32> to vector<16x128xf32>
    %145 = arith.addf %142, %144 : vector<16x128xf32>
    %146 = arith.addf %131, %145 : vector<16x128xf32>
    %c0_55 = arith.constant 0 : index
    %c0_56 = arith.constant 0 : index
    %147 = vector.load %arg12[%c0_55, %c0_56] : memref<1x128xf32, #tpu.memory_space<vmem>>, vector<1x128xf32>
    %c0_57 = arith.constant 0 : index
    %c0_58 = arith.constant 0 : index
    %148 = vector.load %arg13[%c0_57, %c0_58] : memref<1x128xf32, #tpu.memory_space<vmem>>, vector<1x128xf32>
    %cst_59 = arith.constant dense<0.000000e+00> : vector<16xf32>
    %149 = vector.multi_reduction <add>, %146, %cst_59 [1] : vector<16x128xf32> to vector<16xf32>
    %150 = vector.shape_cast %149 : vector<16xf32> to vector<16x1xf32>
    %cst_60 = arith.constant 1.280000e+02 : f32
    %151 = vector.broadcast %cst_60 : f32 to vector<16x1xf32>
    %152 = arith.divf %150, %151 : vector<16x1xf32>
    %153 = vector.broadcast %152 : vector<16x1xf32> to vector<16x128xf32>
    %154 = arith.subf %146, %153 : vector<16x128xf32>
    %155 = arith.mulf %154, %154 : vector<16x128xf32>
    %cst_61 = arith.constant dense<0.000000e+00> : vector<16xf32>
    %156 = vector.multi_reduction <add>, %155, %cst_61 [1] : vector<16x128xf32> to vector<16xf32>
    %157 = vector.shape_cast %156 : vector<16xf32> to vector<16x1xf32>
    %cst_62 = arith.constant 1.280000e+02 : f32
    %158 = vector.broadcast %cst_62 : f32 to vector<16x1xf32>
    %159 = arith.divf %157, %158 : vector<16x1xf32>
    %cst_63 = arith.constant 9.99999974E-6 : f32
    %160 = vector.broadcast %cst_63 : f32 to vector<16x1xf32>
    %161 = arith.addf %159, %160 : vector<16x1xf32>
    %162 = math.rsqrt %161 : vector<16x1xf32>
    %163 = vector.broadcast %162 : vector<16x1xf32> to vector<16x128xf32>
    %164 = arith.mulf %154, %163 : vector<16x128xf32>
    %165 = vector.broadcast %147 : vector<1x128xf32> to vector<16x128xf32>
    %166 = arith.mulf %164, %165 : vector<16x128xf32>
    %167 = vector.broadcast %148 : vector<1x128xf32> to vector<16x128xf32>
    %168 = arith.addf %166, %167 : vector<16x128xf32>
    %c0_64 = arith.constant 0 : index
    %c0_65 = arith.constant 0 : index
    %c0_66 = arith.constant 0 : index
    %169 = vector.load %arg14[%c0_64, %c0_65, %c0_66] : memref<1x16x128xf32, #tpu.memory_space<vmem>>, vector<1x16x128xf32>
    %170 = vector.shape_cast %169 : vector<1x16x128xf32> to vector<16x128xf32>
    %171 = vector.shape_cast %168 : vector<16x128xf32> to vector<1x16x128xf32>
    tpu.vector_store %arg14[%c0_64, %c0_65, %c0_66], %171 {strides = array<i32>} : memref<1x16x128xf32, #tpu.memory_space<vmem>>, vector<1x16x128xf32>,
    return
  }
  func.func @transform_0(%arg0: i32) -> (i32, i32, i32) {
    %c0_i32 = arith.constant 0 : i32
    %c0_i32_0 = arith.constant 0 : i32
    %c0_i32_1 = arith.constant 0 : i32
    return %arg0, %c0_i32, %c0_i32_0 : i32, i32, i32
  }
  func.func @transform_1(%arg0: i32) -> (i32, i32) {
    %c0_i32 = arith.constant 0 : i32
    %c0_i32_0 = arith.constant 0 : i32
    %c0_i32_1 = arith.constant 0 : i32
    return %c0_i32, %c0_i32_0 : i32, i32
  }
  func.func @transform_2(%arg0: i32) -> (i32, i32) {
    %c0_i32 = arith.constant 0 : i32
    %c0_i32_0 = arith.constant 0 : i32
    %c0_i32_1 = arith.constant 0 : i32
    return %c0_i32, %c0_i32_0 : i32, i32
  }
  func.func @transform_3(%arg0: i32) -> (i32, i32) {
    %c0_i32 = arith.constant 0 : i32
    %c0_i32_0 = arith.constant 0 : i32
    %c0_i32_1 = arith.constant 0 : i32
    return %c0_i32, %c0_i32_0 : i32, i32
  }
  func.func @transform_4(%arg0: i32) -> (i32, i32) {
    %c0_i32 = arith.constant 0 : i32
    %c0_i32_0 = arith.constant 0 : i32
    %c0_i32_1 = arith.constant 0 : i32
    return %c0_i32, %c0_i32_0 : i32, i32
  }
  func.func @transform_5(%arg0: i32) -> (i32, i32) {
    %c0_i32 = arith.constant 0 : i32
    %c0_i32_0 = arith.constant 0 : i32
    %c0_i32_1 = arith.constant 0 : i32
    return %c0_i32, %c0_i32_0 : i32, i32
  }
  func.func @transform_6(%arg0: i32) -> (i32, i32) {
    %c0_i32 = arith.constant 0 : i32
    %c0_i32_0 = arith.constant 0 : i32
    %c0_i32_1 = arith.constant 0 : i32
    return %c0_i32, %c0_i32_0 : i32, i32
  }
  func.func @transform_7(%arg0: i32) -> (i32, i32) {
    %c0_i32 = arith.constant 0 : i32
    %c0_i32_0 = arith.constant 0 : i32
    %c0_i32_1 = arith.constant 0 : i32
    return %c0_i32, %c0_i32_0 : i32, i32
  }
  func.func @transform_8(%arg0: i32) -> (i32, i32) {
    %c0_i32 = arith.constant 0 : i32
    %c0_i32_0 = arith.constant 0 : i32
    %c0_i32_1 = arith.constant 0 : i32
    return %c0_i32, %c0_i32_0 : i32, i32
  }
  func.func @transform_9(%arg0: i32) -> (i32, i32) {
    %c0_i32 = arith.constant 0 : i32
    %c0_i32_0 = arith.constant 0 : i32
    %c0_i32_1 = arith.constant 0 : i32
    return %c0_i32, %c0_i32_0 : i32, i32
  }
  func.func @transform_10(%arg0: i32) -> (i32, i32) {
    %c0_i32 = arith.constant 0 : i32
    %c0_i32_0 = arith.constant 0 : i32
    %c0_i32_1 = arith.constant 0 : i32
    return %c0_i32, %c0_i32_0 : i32, i32
  }
  func.func @transform_11(%arg0: i32) -> (i32, i32) {
    %c0_i32 = arith.constant 0 : i32
    %c0_i32_0 = arith.constant 0 : i32
    %c0_i32_1 = arith.constant 0 : i32
    return %c0_i32, %c0_i32_0 : i32, i32
  }
  func.func @transform_12(%arg0: i32) -> (i32, i32) {
    %c0_i32 = arith.constant 0 : i32
    %c0_i32_0 = arith.constant 0 : i32
    %c0_i32_1 = arith.constant 0 : i32
    return %c0_i32, %c0_i32_0 : i32, i32
  }
  func.func @transform_13(%arg0: i32) -> (i32, i32, i32) {
    %c0_i32 = arith.constant 0 : i32
    %c0_i32_0 = arith.constant 0 : i32
    %c0_i32_1 = arith.constant 0 : i32
    return %arg0, %c0_i32, %c0_i32_0 : i32, i32, i32
  }
}

</mosaic_0001>

<bundles_post_ra>
// kernel: et_bert_forward.3
= control target key start
LH: loop header
LB: loop body
LE: loop exit
PB: predicated region body
PF: predicated region fallthrough
CT: control target
= control target key end

     0   :  { %s2576_s0 = inlined_call_operand.vmem [shape: f32[2,16,128], index: 0, kind: input, shape index: {}]   ;;  %s2577_s1 = inlined_call_operand.vmem [shape: bf16[128,384], index: 1, kind: input, shape index: {}]   ;;  %s2578_s2 = inlined_call_operand.vmem [shape: f32[1,384], index: 2, kind: input, shape index: {}]   ;;  %s2579_s3 = inlined_call_operand.hbm [shape: bf16[128,128], index: 3, kind: input, shape index: {}]   ;;  %s2580_s4 = inlined_call_operand.vmem [shape: f32[1,128], index: 4, kind: input, shape index: {}]   ;;  %s2581_s5 = inlined_call_operand.vmem [shape: f32[1,128], index: 5, kind: input, shape index: {}]   ;;  %s2582_s6 = inlined_call_operand.vmem [shape: f32[1,128], index: 6, kind: input, shape index: {}]   ;;  %s2583_s7 = inlined_call_operand.hbm [shape: bf16[128,256], index: 7, kind: input, shape index: {}]   ;;  %s2584_s8 = inlined_call_operand.vmem [shape: f32[1,256], index: 8, kind: input, shape index: {}]   ;;  %s2585_s9 = inlined_call_operand.hbm [shape: bf16[256,128], index: 9, kind: input, shape index: {}]   ;;  %s2586_s10 = inlined_call_operand.vmem [shape: f32[1,128], index: 10, kind: input, shape index: {}]   ;;  %s2587_s11 = inlined_call_operand.vmem [shape: f32[1,128], index: 11, kind: input, shape index: {}]   ;;  %s2588_s12 = inlined_call_operand.vmem [shape: f32[1,128], index: 12, kind: input, shape index: {}]   ;;  %s2589_s13 = inlined_call_operand.vmem [shape: f32[2,16,128], index: 13, kind: output, shape index: {}]  }
   0x1   :  { %2590 = sst [smem:[#allocation9_spill]] %s2579_s3 }
   0x2   :  { %18 = vsyncpa [#allocation3], 0 }
   0x3   :  { %19 = vsyncpa [#allocation5], 0  ;;  %s2255_s25 = smov 0  }
   0x4 LB: > { %s374_s28 = sshll.u32 %s2583_s7, 4  ;;  %s2264_s29 = sadd.s32 4294967295, %s2172_s25   ;;  %s2172_s25 = sphi %s2255_s25, %s25_s25   ;;  %s375_s28 = int_to_ptr.hbm [resolvable:$true] %s374_s28 }
   0x5   : > { %p1624_p0 = scmp.ge.s32.totalorder %s2172_s25, 1  ;;  %p334_p1 = scmp.lt.s32.totalorder %s2172_s25, 3 }
   0x6   : > { %p1995_p2 = scmp.eq.s32.totalorder %s2264_s29, 0  ;;  %s2174_s14 = smov [#allocation4]  }
   0x7   : > { %p2269_p3 = pnand %p1624_p0, %p334_p1  ;;  %s376_s15 = sshll.u32 %s2174_s14, 4  ;;  %s377_s15 = int_to_ptr.vmem [resolvable:$true] %s376_s15 }
   0x8   : > { %s2592_s3 = sld [smem:[#allocation9_spill]]  ;;  %s2175_s20 = smov [#allocation2]  }
   0x9   : > { %p1985_p4 = pneg %p2269_p3  ;;  %s353_s21 = sshll.u32 %s2175_s20, 4  ;;  %s354_s21 = int_to_ptr.vmem [resolvable:$true] %s353_s21 }
   0xa   : > { %s2176_s22 = smov 128   ;;  %s2177_s23 = smov 8  }
   0xb   : > { %p2280_p5 = pnand %p1995_p2, %p1985_p4  ;;  %s391_s27 = sshll.u32 %s2585_s9, 4  ;;  %s392_s27 = int_to_ptr.hbm [resolvable:$true] %s391_s27 }
   0xc   : > { %s2178_s14 = smov 64   ;;  %s2179_s16 = smov 4  }
   0xd   : > { %1991 = dma.hbm_to_vmem [thread:$0]  (!%p2280_p5), %s375_s28, 2048, %s377_s15, [#allocation5], %s2176_s22, %s2176_s22, %s2177_s23  }
   0xe   : > { %s351_s18 = sshll.u32 %s2592_s3, 4  ;;  %s2180_s17 = smov [#allocation6]   ;;  %s352_s18 = int_to_ptr.hbm [resolvable:$true] %s351_s18 }
   0xf   : > { %1988 = dma.hbm_to_vmem [thread:$0]  (!%p2280_p5), %s352_s18, 1024, %s354_s21, [#allocation3], %s2178_s14, %s2178_s14, %s2179_s16  }
  0x10   : > { %s393_s3 = sshll.u32 %s2180_s17, 4  ;;  %426 = sbr.rel (%p2269_p3) target bundleno = 2281 (0x8e9), region = 72  ;;  %s394_s3 = int_to_ptr.vmem [resolvable:$true] %s393_s3 }
  0x11   : > { %1994 = dma.hbm_to_vmem [thread:$0]  (!%p2280_p5), %s392_s27, 2048, %s394_s3, [#allocation5], %s2178_s14, %s2178_s14, %s2179_s16  }
  0x15   : > { %2163 = dma.done.wait (%p1995_p2), [#allocation3], 1024  }
  0x16   : > { %2165 = vsyncadd (%p1995_p2), [#allocation3], 4294966272 }
  0x17   : > { %2167 = dma.done.wait (%p1995_p2), [#allocation5], 4096  }
  0x18   : > { %2169 = vsyncadd (%p1995_p2), [#allocation5], 4294963200  ;;  %v1723_v0 = vld [vmem:[%s2577_s1 + $0xa8] sm:$0xf]  ;;  %v1931_v1 = vld [vmem:[%s2577_s1 + $0xb0] sm:$0xf0] }
  0x19   : > { %v1930_v2 = vld [vmem:[%s2577_s1 + $0xac] sm:$0xf]  ;;  %v1724_v3 = vor.u32 %v1931_v1, %v1723_v0  ;;  %v1725_v4 = vld [vmem:[%s2577_s1 + $0xb4] sm:$0xf0]  ;;  %v1711_v5 = vld [vmem:[%s2577_s1 + $0x90] sm:$0xf] }
  0x1a   : > { %v1928_v6 = vld [vmem:[%s2577_s1 + $0x98] sm:$0xf0]  ;;  %v1728_v7 = vor.u32 %v1930_v2, %v1725_v4  ;;  %v1927_v8 = vld [vmem:[%s2577_s1 + $0x94] sm:$0xf]  ;;  %v1713_v9 = vld [vmem:[%s2577_s1 + $0x9c] sm:$0xf0] }
  0x1b   : > { %663 = vmatpush.bf16.msra.mxu0 %v1724_v3  ;;  %v1712_v10 = vor.u32 %v1928_v6, %v1711_v5  ;;  %v1716_v11 = vor.u32 %v1927_v8, %v1713_v9  ;;  %v1699_v12 = vld [vmem:[%s2577_s1 + $0x78] sm:$0xf]  ;;  %v1925_v13 = vld [vmem:[%s2577_s1 + $0x80] sm:$0xf0]  ;;  %v1924_v14 = vld [vmem:[%s2577_s1 + $0x7c] sm:$0xf] }
  0x1c   : > { %677 = vmatpush.bf16.msra.mxu1 %v1728_v7  ;;  %v1701_v15 = vld [vmem:[%s2577_s1 + $0x84] sm:$0xf0]  ;;  %v1700_v16 = vor.u32 %v1925_v13, %v1699_v12  ;;  %v1687_v18 = vld [vmem:[%s2577_s1 + $0x60] sm:$0xf]  ;;  %v1922_v19 = vld [vmem:[%s2577_s1 + $0x68] sm:$0xf0] }
  0x1d   : > { %v1704_v17 = vor.u32 %v1924_v14, %v1701_v15  ;;  %v1921_v20 = vld [vmem:[%s2577_s1 + $0x64] sm:$0xf]  ;;  %v1689_v21 = vld [vmem:[%s2577_s1 + $0x6c] sm:$0xf0]  ;;  %p481_p6 = scmp.lt.s32.totalorder %s2264_s29, 1  ;;  %v1688_v22 = vor.u32 %v1922_v19, %v1687_v18  ;;  %vm710_vm0 = vcmask 261120  }
  0x1e   : > { %v1675_v23 = vld [vmem:[%s2577_s1 + $0x48] sm:$0xf]  ;;  %v1731_v24 = vld [vmem:[%s2577_s1 + $0xb0] sm:$0xf]  ;;  %v1932_v25 = vld [vmem:[%s2577_s1 + $0xb8] sm:$0xf0]  ;;  %v1692_v26 = vor.u32 %v1921_v20, %v1689_v21 }
  0x1f   : > { %664 = vmatpush.bf16.msra.mxu0 %v1712_v10  ;;  %v1919_v27 = vld [vmem:[%s2577_s1 + $0x50] sm:$0xf0]  ;;  %v1732_v28 = vor.u32 %v1932_v25, %v1731_v24  ;;  %v1719_v29 = vld [vmem:[%s2577_s1 + $0x98] sm:$0xf]  ;;  %v1929_v30 = vld [vmem:[%s2577_s1 + $0xa0] sm:$0xf0] }
  0x20   : > { %678 = vmatpush.bf16.msra.mxu1 %v1716_v11  ;;  %v1918_v31 = vld [vmem:[%s2577_s1 + $0x4c] sm:$0xf]  ;;  %v1677_v32 = vld [vmem:[%s2577_s1 + $0x54] sm:$0xf0]  ;;  %v1720_v33 = vor.u32 %v1929_v30, %v1719_v29  ;;  %v1676_v34 = vor.u32 %v1919_v27, %v1675_v23  ;;  %s2595_s29 = smov (!%p481_p6, %s2264_s29), 1  ;;  %s2181_s22 = smov 96  }
  0x21   : > { %691 = vmatpush.bf16.msra.mxu2 %v1732_v28  ;;  %v1707_v35 = vld [vmem:[%s2577_s1 + $0x80] sm:$0xf]  ;;  %v1926_v36 = vld [vmem:[%s2577_s1 + $0x88] sm:$0xf0]  ;;  %v1680_v37 = vor.u32 %v1918_v31, %v1677_v32  ;;  %v1663_v38 = vld [vmem:[%s2577_s1 + $0x30] sm:$0xf] }
  0x22   : > { %v1916_v39 = vld [vmem:[%s2577_s1 + $0x38] sm:$0xf0]  ;;  %v1915_v40 = vld [vmem:[%s2577_s1 + $0x34] sm:$0xf]  ;;  %v1665_v41 = vld [vmem:[%s2577_s1 + $0x3c] sm:$0xf0]  ;;  %v1708_v42 = vor.u32 %v1926_v36, %v1707_v35 }
  0x23   : > { %665 = vmatpush.bf16.msra.mxu0 %v1700_v16  ;;  %v1664_v43 = vor.u32 %v1916_v39, %v1663_v38  ;;  %v1695_v44 = vld [vmem:[%s2577_s1 + $0x68] sm:$0xf]  ;;  %v1923_v45 = vld [vmem:[%s2577_s1 + $0x70] sm:$0xf0]  ;;  %v1668_v46 = vor.u32 %v1915_v40, %v1665_v41  ;;  %v1651_v47 = vld [vmem:[%s2577_s1 + $0x18] sm:$0xf] }
  0x24   : > { %679 = vmatpush.bf16.msra.mxu1 %v1704_v17  ;;  %v1913_v48 = vld [vmem:[%s2577_s1 + $0x20] sm:$0xf0]  ;;  %s1907_s30 = sshll.u32 %s2595_s29, 4  ;;  %v1912_v49 = vld [vmem:[%s2577_s1 + $0x1c] sm:$0xf]  ;;  %v1696_v51 = vor.u32 %v1923_v45, %v1695_v44  ;;  %s2182_s23 = smov 32  }
  0x25   : > { %692 = vmatpush.bf16.msra.mxu2 %v1720_v33  ;;  %v1653_v50 = vld [vmem:[%s2577_s1 + $0x24] sm:$0xf0]  ;;  %v1652_v52 = vor.u32 %v1913_v48, %v1651_v47  ;;  %s485_s26 = scalar_lea.vmem %s2576_s0, %s1907_s30  ;;  %v1683_v53 = vld [vmem:[%s2577_s1 + $0x50] sm:$0xf]  ;;  %v1920_v54 = vld [vmem:[%s2577_s1 + $0x58] sm:$0xf0]  ;;  %s490_s14 = scalar_lea.vmem %s2589_s13, %s1907_s30 }
  0x26   : > { %v1656_v55 = vor.u32 %v1912_v49, %v1653_v50  ;;  %v1639_v56 = vld [vmem:[%s2577_s1] sm:$0xf]  ;;  %v1910_v57 = vld [vmem:[%s2577_s1 + $0x8] sm:$0xf0]  ;;  %v1909_v58 = vld [vmem:[%s2577_s1 + $0x4] sm:$0xf]  ;;  %v1684_v61 = vor.u32 %v1920_v54, %v1683_v53 }
  0x27   : > { %666 = vmatpush.bf16.msra.mxu0 %v1688_v22  ;;  %v1641_v59 = vld [vmem:[%s2577_s1 + $0xc] sm:$0xf0]  ;;  %v2441_v60 = vld [vmem:[%s485_s26] sm:$0xff]  ;;  %v1640_v62 = vor.u32 %v1910_v57, %v1639_v56  ;;  %v2443_v63 = vld [vmem:[%s485_s26 + $0x8] sm:$0xff]  ;;  %s2183_s24 = smov 64   ;;  %vm731_vm1 = vcmask 130048  }
  0x28   : > { %680 = vmatpush.bf16.msra.mxu1 %v1692_v26  ;;  %v1671_v0 = vld [vmem:[%s2577_s1 + $0x38] sm:$0xf]  ;;  %v1917_v1 = vld [vmem:[%s2577_s1 + $0x40] sm:$0xf0]  ;;  %v1644_v2 = vor.u32 %v1909_v58, %v1641_v59  ;;  %v494_v3 = vpack.c.bf16 %v2443_v63, %v2441_v60  ;;  %v1659_v5 = vld [vmem:[%s2577_s1 + $0x20] sm:$0xf] }
  0x29   : > { %693 = vmatpush.bf16.msra.mxu2 %v1708_v42  ;;  %v1672_v4 = vor.u32 %v1917_v1, %v1671_v0  ;;  %v1914_v6 = vld [vmem:[%s2577_s1 + $0x28] sm:$0xf0]  ;;  %v1647_v8 = vld [vmem:[%s2577_s1 + $0x8] sm:$0xf]  ;;  %v1911_v9 = vld [vmem:[%s2577_s1 + $0x10] sm:$0xf0] }
  0x2a   : > { %v1660_v7 = vor.u32 %v1914_v6, %v1659_v5  ;;  %v1648_v10 = vor.u32 %v1911_v9, %v1647_v8  ;;  %v527_v13 = vld [vmem:[%s2578_s2] sm:$0x7]  ;;  %v1934_v39 = vld [vmem:[#allocation2 + $0x8] sm:$0xff] }
  0x2b   : > { %667 = vmatpush.bf16.msra.mxu0 %v1676_v34  ;;  %v530_v14 = vperm.slane %v527_v13, 1  ;;  %v529_v17 = vperm.slane %v527_v13, 0  ;;  %v531_v28 = vperm.slane %v527_v13, 2  ;;  %v1933_v40 = vld [vmem:[#allocation2] sm:$0xff] }
  0x2c   : > { %681 = vmatpush.bf16.msra.mxu1 %v1680_v37 }
  0x2d   : > { %694 = vmatpush.bf16.msra.mxu2 %v1696_v51 }
  0x2f   : > { %668 = vmatpush.bf16.msra.mxu0 %v1664_v43 }
  0x30   : > { %682 = vmatpush.bf16.msra.mxu1 %v1668_v46 }
  0x31   : > { %695 = vmatpush.bf16.msra.mxu2 %v1684_v61 }
  0x33   : > { %669 = vmatpush.bf16.msra.mxu0 %v1652_v52 }
  0x34   : > { %683 = vmatpush.bf16.msra.mxu1 %v1656_v55 }
  0x35   : > { %696 = vmatpush.bf16.msra.mxu2 %v1672_v4 }
  0x37   : > { %670 = vmatpush.bf16.msra.mxu0 %v1640_v62 }
  0x38   : > { %684 = vmatpush.bf16.msra.mxu1 %v1644_v2 }
  0x39   : > { %697 = vmatpush.bf16.msra.mxu2 %v1660_v7 }
  0x3a   : > { %671 = vmatmul.bf16.vlgmr.msra.gmra.mxu0 %v494_v3 }
  0x3b   : > { %685 = vmatmul.bf16.vlgmr.msra.gmra.mxu1 %v494_v3 }
  0x3d   : > { %698 = vmatpush.bf16.msra.mxu2 %v1648_v10 }
  0x40   : > { %699 = vmatmul.bf16.vlgmr.msra.gmra.mxu2 %v494_v3 }
  0x41   : > { %902 = vmatpush.bf16.msrb.mxu2 %v1934_v39 }
  0x45   : > { %903 = vmatpush.bf16.msrb.mxu2 %v1933_v40 }
  0xb7   : > { %v672_v11 = vpop.f32.mrf.mxu0 }
  0xb8   : > { %v686_v12 = vpop.f32.mrf.mxu1  ;;  %v673_v22 = vadd.f32 %v672_v11, %v529_v17 }
  0xb9   : > { %v687_v18 = vadd.f32 %v686_v12, %v530_v14 }
  0xba   : > { %v705_v26 = vmul.f32 0.17677669, %v673_v22 }
  0xbf   : > { %v674_v15 = vpop.f32.mrf.mxu0 }
  0xc0   : > { %v688_v16 = vpop.f32.mrf.mxu1  ;;  %v675_v20 = vadd.f32 %v674_v15, %v529_v17 }
  0xc1   : > { %v689_v19 = vadd.f32 %v688_v16, %v530_v14 }
  0xc2   : > { %v706_v24 = vmul.f32 0.17677669, %v675_v20 }
  0xc3   : > { %v708_v21 = vpack.c.bf16 %v689_v19, %v687_v18  ;;  %v700_v25 = vpop.f32.mrf.mxu2 }
  0xc4   : > { %v707_v27 = vpack.c.bf16 %v706_v24, %v705_v26  ;;  %v701_v29 = vadd.f32 %v700_v25, %v531_v28 }
  0xc5   : > { %781 = vrot.lane.b32.xlu2 %v708_v21, %s2181_s22  ;;  %v715_v23 = vsel %vm710_vm0, %v708_v21, 0 }
  0xc6   : > { %724 = vmatpush.bf16.xpose.msra.mxu3 %v715_v23 }
  0xcb   : > { %v702_v30 = vpop.f32.mrf.mxu2 }
  0xcc   : > { %v703_v31 = vadd.f32 %v702_v30, %v531_v28 }
  0xcd   : > { %778 = vrot.lane.b32.xlu2 %v707_v27, %s2181_s22  ;;  %1733 = vmatmul.msk.bf16.vlgmr.msra.gmra.mxu3 %vm710_vm0, %v707_v27 }
  0xce   : > { %v2472_v32 = vpack.c.bf16 %v703_v31, %v701_v29 }
  0xd0   : > { %765 = vmatpush.bf16.msrb.mxu3 %v2472_v32 }
  0xd5   : > { %1013 = vrot.lane.b32.xlu2 %v707_v27, %s2182_s23 }
  0xdd   : > { %910 = vrot.lane.b32.xlu2 %v707_v27, %s2183_s24 }
 0x11f   : > { %v782_v33 = vpop.permute.xlu2 %781 }
 0x120   : > { %v787_v34 = vsel %vm710_vm0, %v782_v33, 0 }
 0x121   : > { %796 = vmatpush.bf16.xpose.msra.mxu3 %v787_v34 }
 0x127   : > { %v779_v61 = vpop.permute.xlu2 %778 }
 0x12f   : > { %v1014_v1 = vpop.permute.xlu2 %1013 }
 0x137   : > { %v911_v2 = vpop.permute.xlu2 %910 }
 0x150   : > { %v726_v35 = vpop.f32.mrf.mxu3 }
 0x151   : > { %v732_v36 = vsel %vm731_vm1, %v726_v35, -inf }
 0x152   : > { %733 = vmax.xlane.f32.xlu0 %v732_v36 }
 0x158   : > { %v728_v37 = vpop.f32.mrf.mxu3 }
 0x159   : > { %v735_v38 = vsel %vm731_vm1, %v728_v37, -inf }
 0x15a   : > { %736 = vmax.xlane.f32.xlu0 %v735_v38 }
 0x16e   : > { %1015 = vrot.lane.b32.xlu0 %v708_v21, %s2182_s23 }
 0x1c5   : > { %v734_v41 = vpop.xlane.xlu0 %733 }
 0x1c6   : > { %v738_v42 = vsub.f32 %v726_v35, %v734_v41 }
 0x1c8   : > { %v740_v43 = vmul.f32 1.442695, %v738_v42 }
 0x1ca   : > { %2026 = vpow2.f32 %v740_v43 }
 0x1cd   : > { %v737_v44 = vpop.xlane.xlu0 %736 }
 0x1ce   : > { %v739_v45 = vsub.f32 %v728_v37, %v737_v44 }
 0x1d0   : > { %v2027_v46 = vpop.eup %2026  ;;  %v742_v47 = vmul.f32 1.442695, %v739_v45 }
 0x1d1   : > { %v744_v48 = vsel %vm731_vm1, %v2027_v46, 0.0 }
 0x1d2   : > { %2028 = vpow2.f32 %v742_v47  ;;  %745 = vadd.xlane.f32.xlu1 %v744_v48 }
 0x1d8   : > { %v2029_v49 = vpop.eup %2028 }
 0x1d9   : > { %v747_v50 = vsel %vm731_vm1, %v2029_v49, 0.0 }
 0x1da   : > { %748 = vadd.xlane.f32.xlu1 %v747_v50 }
 0x1e0   : > { %v1016_v51 = vpop.permute.xlu0 %1015 }
 0x1e1   : > { %v1021_v52 = vsel %vm710_vm0, %v1016_v51, 0 }
 0x1e2   : > { %1030 = vmatpush.bf16.xpose.msra.mxu2 %v1021_v52 }
 0x1f3   : > { %912 = vrot.lane.b32.xlu1 %v708_v21, %s2183_s24 }
 0x245   : > { %v746_v53 = vpop.xlane.xlu1 %745 }
 0x246   : > { %2030 = vrcp.f32 %v746_v53 }
 0x24c   : > { %v2031_v55 = vpop.eup %2030 }
 0x24d   : > { %v749_v54 = vpop.xlane.xlu1 %748  ;;  %v752_v57 = vmul.f32 %v2031_v55, %v2027_v46 }
 0x24e   : > { %2032 = vrcp.f32 %v749_v54 }
 0x254   : > { %v2033_v56 = vpop.eup %2032 }
 0x255   : > { %v753_v58 = vmul.f32 %v2033_v56, %v2029_v49 }
 0x257   : > { %v754_v59 = vpack.c.bf16 %v753_v58, %v752_v57 }
 0x259   : > { %1734 = vmatmul.msk.bf16.vlgmr.msrb.gmra.mxu3 %vm731_vm1, %v754_v59  ;;  %v1936_v59 = vld [vmem:[#allocation2 + $0x18] sm:$0xff] }
 0x25a   : > { %873 = vmatpush.bf16.msrb.mxu1 %v1936_v59  ;;  %v1956_v59 = vld [vmem:[#allocation4 + $0x74] sm:$0xf0] }
 0x265   : > { %v913_v62 = vpop.permute.xlu1 %912 }
 0x266   : > { %v918_v0 = vsel %vm710_vm0, %v913_v62, 0 }
 0x267   : > { %927 = vmatpush.bf16.xpose.msrb.mxu3 %v918_v0 }
 0x269   : > { %1735 = vmatmul.msk.bf16.vlgmr.msra.gmra.mxu3 %vm710_vm0, %v779_v61  ;;  %v1935_v61 = vld [vmem:[#allocation2 + $0x10] sm:$0xff] }
 0x26a   : > { %874 = vmatpush.bf16.msrb.mxu1 %v1935_v61  ;;  %v1955_v61 = vld [vmem:[#allocation4 + $0x74] sm:$0xf] }
 0x279   : > { %1755 = vmatmul.msk.bf16.vlgmr.msrb.gmra.mxu3 %vm710_vm0, %v911_v2 }
 0x2dc   : > { %v767_v3 = vpop.f32.mrf.mxu3 }
 0x2e4   : > { %v769_v4 = vpop.f32.mrf.mxu3 }
 0x2e5   : > { %v772_v5 = vpack.c.bf16 %v769_v4, %v767_v3 }
 0x2e7   : > { %1754 = vmatmul.msk.bf16.vlgmr.msrb.gmra.mxu2 %vm710_vm0, %v772_v5 }
 0x2ec   : > { %v798_v6 = vpop.f32.mrf.mxu3 }
 0x2ed   : > { %v803_v7 = vsel %vm731_vm1, %v798_v6, -inf }
 0x2ee   : > { %804 = vmax.xlane.f32.xlu2 %v803_v7 }
 0x2f4   : > { %v800_v8 = vpop.f32.mrf.mxu3 }
 0x2f5   : > { %v806_v9 = vsel %vm731_vm1, %v800_v8, -inf }
 0x2f6   : > { %807 = vmax.xlane.f32.xlu0 %v806_v9 }
 0x2f7   : > { %1766 = vmatmul.msk.bf16.vlgmr.msra.gmra.mxu2 %vm710_vm0, %v1014_v1 }
 0x2fc   : > { %v929_v10 = vpop.f32.mrf.mxu3 }
 0x2fd   : > { %v934_v11 = vsel %vm731_vm1, %v929_v10, -inf }
 0x2fe   : > { %935 = vmax.xlane.f32.xlu0 %v934_v11 }
 0x304   : > { %v931_v33 = vpop.f32.mrf.mxu3 }
 0x305   : > { %v937_v34 = vsel %vm731_vm1, %v931_v33, -inf }
 0x361   : > { %v805_v16 = vpop.xlane.xlu2 %804 }
 0x362   : > { %v809_v17 = vsub.f32 %v798_v6, %v805_v16 }
 0x364   : > { %v811_v21 = vmul.f32 1.442695, %v809_v17 }
 0x369   : > { %v808_v12 = vpop.xlane.xlu0 %807 }
 0x36a   : > { %v810_v13 = vsub.f32 %v800_v8, %v808_v12  ;;  %v2494_v14 = vpop.f32.mrf.mxu2 }
 0x36c   : > { %v813_v15 = vmul.f32 1.442695, %v810_v13 }
 0x36e   : > { %2034 = vpow2.f32 %v813_v15 }
 0x36f   : > { %2036 = vpow2.f32 %v811_v21  ;;  %v1938_v21 = vld [vmem:[#allocation2 + $0x28] sm:$0xff] }
 0x370   : > { %1003 = vmatpush.bf16.msra.mxu1 %v1938_v21  ;;  %v1803_v21 = vld [vmem:[#allocation4 + $0x30] sm:$0xf] }
 0x371   : > { %v936_v22 = vpop.xlane.xlu0 %935 }
 0x372   : > { %v2496_v18 = vpop.f32.mrf.mxu2  ;;  %v940_v23 = vsub.f32 %v929_v10, %v936_v22  ;;  %v1937_v22 = vld [vmem:[#allocation2 + $0x20] sm:$0xff] }
 0x374   : > { %v2035_v19 = vpop.eup %2034  ;;  %v942_v26 = vmul.f32 1.442695, %v940_v23  ;;  %1004 = vmatpush.bf16.msra.mxu1 %v1937_v22  ;;  %v1948_v22 = vld [vmem:[#allocation4 + $0x34] sm:$0xf0] }
 0x375   : > { %v818_v20 = vsel %vm731_vm1, %v2035_v19, 0.0  ;;  %v2037_v27 = vpop.eup %2036 }
 0x376   : > { %819 = vadd.xlane.f32.xlu0 %v818_v20  ;;  %2038 = vpow2.f32 %v942_v26  ;;  %v815_v29 = vsel %vm731_vm1, %v2037_v27, 0.0  ;;  %v1939_v20 = vld [vmem:[#allocation2 + $0x30] sm:$0xff] }
 0x37a   : > { %v1032_v24 = vpop.f32.mrf.mxu2 }
 0x37b   : > { %v1037_v25 = vsel %vm731_vm1, %v1032_v24, -inf }
 0x37c   : > { %1038 = vmax.xlane.f32.xlu1 %v1037_v25  ;;  %v2502_v31 = vpop.eup %2038 }
 0x37d   : > { %v946_v35 = vsel %vm731_vm1, %v2502_v31, 0.0 }
 0x382   : > { %v1034_v28 = vpop.f32.mrf.mxu2 }
 0x383   : > { %v1040_v30 = vsel %vm731_vm1, %v1034_v28, -inf }
 0x384   : > { %816 = vadd.xlane.f32.xlu1 %v815_v29  ;;  %1041 = vmax.xlane.f32.xlu2 %v1040_v30 }
 0x38c   : > { %938 = vmax.xlane.f32.xlu2 %v937_v34  ;;  %947 = vadd.xlane.f32.xlu1 %v946_v35 }
 0x3a4   : > { %827 = vrot.lane.b32.xlu2 %v2472_v32, %s2181_s22 }
 0x3e9   : > { %v820_v42 = vpop.xlane.xlu0 %819 }
 0x3ef   : > { %v1039_v36 = vpop.xlane.xlu1 %1038 }
 0x3f0   : > { %v1043_v37 = vsub.f32 %v1032_v24, %v1039_v36  ;;  %v2020_v36 = vld [vmem:[%s2580_s4] ss:$0 sm:$0xff] }
 0x3f2   : > { %v1045_v38 = vmul.f32 1.442695, %v1043_v37 }
 0x3f4   : > { %2040 = vpow2.f32 %v1045_v38 }
 0x3f7   : > { %v1042_v39 = vpop.xlane.xlu2 %1041  ;;  %v817_v40 = vpop.xlane.xlu1 %816 }
 0x3f8   : > { %2042 = vrcp.f32 %v817_v40  ;;  %v1044_v47 = vsub.f32 %v1034_v28, %v1042_v39 }
 0x3f9   : > { %2044 = vrcp.f32 %v820_v42 }
 0x3fa   : > { %v2041_v41 = vpop.eup %2040  ;;  %v1047_v51 = vmul.f32 1.442695, %v1044_v47 }
 0x3fb   : > { %v1049_v43 = vsel %vm731_vm1, %v2041_v41, 0.0 }
 0x3fc   : > { %1050 = vadd.xlane.f32.xlu1 %v1049_v43 }
 0x3fe   : > { %v2043_v46 = vpop.eup %2042 }
 0x3ff   : > { %v939_v44 = vpop.xlane.xlu2 %938  ;;  %v2045_v49 = vpop.eup %2044  ;;  %v823_v50 = vmul.f32 %v2043_v46, %v2037_v27  ;;  %v2184_v46 = vmov 128.0  }
 0x400   : > { %v941_v45 = vsub.f32 %v931_v33, %v939_v44  ;;  %v824_v52 = vmul.f32 %v2045_v49, %v2035_v19  ;;  %v948_v62 = vpop.xlane.xlu1 %947  ;;  %v1940_v19 = vld [vmem:[#allocation2 + $0x38] sm:$0xff] }
 0x402   : > { %v944_v48 = vmul.f32 1.442695, %v941_v45  ;;  %v825_v54 = vpack.c.bf16 %v824_v52, %v823_v50 }
 0x404   : > { %2046 = vpow2.f32 %v944_v48 }
 0x405   : > { %2048 = vpow2.f32 %v1047_v51 }
 0x407   : > { %v828_v53 = vpop.permute.xlu2 %827 }
 0x408   : > { %840 = vmatpush.bf16.msrb.mxu0 %v828_v53 }
 0x40a   : > { %v2047_v55 = vpop.eup %2046 }
 0x40b   : > { %1736 = vmatmul.msk.bf16.vlgmr.msrb.gmra.mxu0 %vm731_vm1, %v825_v54  ;;  %v949_v56 = vsel %vm731_vm1, %v2047_v55, 0.0  ;;  %v2049_v57 = vpop.eup %2048 }
 0x40c   : > { %950 = vadd.xlane.f32.xlu0 %v949_v56  ;;  %v1052_v58 = vsel %vm731_vm1, %v2049_v57, 0.0 }
 0x414   : > { %1053 = vadd.xlane.f32.xlu0 %v1052_v58  ;;  %v1835_v58 = vld [vmem:[#allocation4 + $0x70] sm:$0xf] }
 0x415   : > { %1060 = vrot.lane.b32.xlu1 %v2472_v32, %s2182_s23 }
 0x428   : > { %957 = vrot.lane.b32.xlu0 %v2472_v32, %s2183_s24 }
 0x46f   : > { %v1051_v0 = vpop.xlane.xlu1 %1050 }
 0x470   : > { %2050 = vrcp.f32 %v1051_v0  ;;  %v1837_v0 = vld [vmem:[#allocation4 + $0x78] sm:$0xf0] }
 0x476   : > { %v2051_v5 = vpop.eup %2050 }
 0x477   : > { %v1057_v7 = vmul.f32 %v2051_v5, %v2041_v41 }
 0x47f   : > { %v951_v1 = vpop.xlane.xlu0 %950 }
 0x487   : > { %v1061_v2 = vpop.permute.xlu1 %1060  ;;  %v1054_v3 = vpop.xlane.xlu0 %1053 }
 0x488   : > { %2052 = vrcp.f32 %v1054_v3  ;;  %v842_v4 = vpop.f32.mrf.mxu0  ;;  %1073 = vmatpush.bf16.msra.mxu3 %v1061_v2  ;;  %v1827_v2 = vld [vmem:[#allocation4 + $0x60] sm:$0xf]  ;;  %v1954_v3 = vld [vmem:[#allocation4 + $0x64] sm:$0xf0] }
 0x489   : > { %2054 = vrcp.f32 %v951_v1  ;;  %v1840_v1 = vor.u32 %v1955_v61, %v1837_v0  ;;  %v1828_v5 = vor.u32 %v1954_v3, %v1827_v2 }
 0x48a   : > { %2056 = vrcp.f32 %v948_v62  ;;  %v1836_v62 = vor.u32 %v1956_v59, %v1835_v58  ;;  %v1970_v58 = vld [vmem:[#allocation6 + $0x68] sm:$0xff] }
 0x48b   : > { %2058 = vrcp.f32 %v2184_v46  ;;  %1300 = vmatpush.bf16.msrb.mxu2 %v1840_v1 }
 0x48e   : > { %v2053_v6 = vpop.eup %2052 }
 0x48f   : > { %v1058_v8 = vmul.f32 %v2053_v6, %v2049_v57  ;;  %v2055_v11 = vpop.eup %2054  ;;  %v1829_v6 = vld [vmem:[#allocation4 + $0x68] sm:$0xf0] }
 0x490   : > { %v844_v9 = vpop.f32.mrf.mxu0  ;;  %v2057_v12 = vpop.eup %2056  ;;  %v955_v13 = vmul.f32 %v2055_v11, %v2047_v55  ;;  %v1821_v11 = vld [vmem:[#allocation4 + $0x58] sm:$0xf0] }
 0x491   : > { %v1059_v32 = vpack.c.bf16 %v1058_v8, %v1057_v7  ;;  %v847_v10 = vpack.c.bf16 %v844_v9, %v842_v4  ;;  %v954_v15 = vmul.f32 %v2057_v12, %v2502_v31  ;;  %v2059_v47 = vpop.eup %2058  ;;  %v1953_v4 = vld [vmem:[#allocation4 + $0x64] sm:$0xf]  ;;  %v1819_v8 = vld [vmem:[#allocation4 + $0x50] sm:$0xf]  ;;  %v1952_v9 = vld [vmem:[#allocation4 + $0x54] sm:$0xf0] }
 0x492   : > { %v1131_v48 = vmul.f32 128.0, %v2059_v47  ;;  %vm1135_vm2 = vweird.f32 %v2059_v47  ;;  %v1832_v7 = vor.u32 %v1953_v4, %v1829_v6 }
 0x493   : > { %1745 = vmatmul.msk.bf16.vlgmr.msrb.gmra.mxu1 %vm710_vm0, %v847_v10  ;;  %1767 = vmatmul.msk.bf16.vlgmr.msra.gmra.mxu3 %vm731_vm1, %v1059_v32  ;;  %v956_v17 = vpack.c.bf16 %v955_v13, %v954_v15  ;;  %v1951_v32 = vld [vmem:[#allocation4 + $0x54] sm:$0xf]  ;;  %v1820_v10 = vor.u32 %v1952_v9, %v1819_v8  ;;  %v1811_v13 = vld [vmem:[#allocation4 + $0x40] sm:$0xf]  ;;  %v1950_v15 = vld [vmem:[#allocation4 + $0x44] sm:$0xf0] }
 0x494   : > { %v1132_v49 = vsub.f32 1.0, %v1131_v48  ;;  %1286 = vmatpush.bf16.msrb.mxu1 %v1836_v62  ;;  %1301 = vmatpush.bf16.msrb.mxu2 %v1832_v7  ;;  %v1824_v12 = vor.u32 %v1951_v32, %v1821_v11  ;;  %v1964_v48 = vld [vmem:[#allocation6 + $0x38] sm:$0xff]  ;;  %v1961_v62 = vld [vmem:[#allocation6 + $0x20] sm:$0xff] }
 0x495   : > { %1452 = vmatpush.bf16.msrb.mxu3 %v1964_v48  ;;  %v2021_v9 = vld [vmem:[%s2581_s5] ss:$0 sm:$0xff] }
 0x496   : > { %v1133_v50 = vmul.f32 %v2059_v47, %v1132_v49  ;;  %v1972_v49 = vld [vmem:[#allocation6 + $0x78] sm:$0xff] }
 0x498   : > { %v1134_v51 = vadd.f32 %v2059_v47, %v1133_v50  ;;  %1287 = vmatpush.bf16.msrb.mxu1 %v1828_v5  ;;  %1302 = vmatpush.bf16.msrb.mxu2 %v1824_v12 }
 0x49a   : > { %v958_v16 = vpop.permute.xlu0 %957 }
 0x49b   : > { %970 = vmatpush.bf16.msra.mxu0 %v958_v16  ;;  %v1949_v16 = vld [vmem:[#allocation4 + $0x44] sm:$0xf] }
 0x49c   : > { %1288 = vmatpush.bf16.msrb.mxu1 %v1820_v10 }
 0x49e   : > { %1756 = vmatmul.msk.bf16.vlgmr.msra.gmra.mxu0 %vm731_vm1, %v956_v17  ;;  %v1812_v17 = vor.u32 %v1950_v15, %v1811_v13  ;;  %v2022_v13 = vld [vmem:[%s2582_s6] ss:$0 sm:$0xff] }
 0x49f   : > { %1106 = vmatpush.bf16.msrb.mxu0 %v1940_v19  ;;  %v1813_v19 = vld [vmem:[#allocation4 + $0x48] sm:$0xf0] }
 0x4a0   : > { %1289 = vmatpush.bf16.msrb.mxu1 %v1812_v17 }
 0x4a3   : > { %1107 = vmatpush.bf16.msrb.mxu0 %v1939_v20  ;;  %v1816_v20 = vor.u32 %v1949_v16, %v1813_v19 }
 0x4a5   : > { %1303 = vmatpush.bf16.msrb.mxu2 %v1816_v20  ;;  %v1969_v20 = vld [vmem:[#allocation6 + $0x60] sm:$0xff] }
 0x4a7   : > { %1466 = vmatpush.bf16.msra.mxu0 %v1972_v49 }
 0x510   : > { %v876_v29 = vpop.f32.mrf.mxu1 }
 0x511   : > { %v906_v31 = vadd.f32 %v2494_v14, %v876_v29  ;;  %v1945_v29 = vld [vmem:[#allocation4 + $0x24] sm:$0xf] }
 0x516   : > { %v1075_v23 = vpop.f32.mrf.mxu3 }
 0x518   : > { %v878_v30 = vpop.f32.mrf.mxu1 }
 0x519   : > { %v908_v39 = vadd.f32 %v2496_v18, %v878_v30  ;;  %v2530_v18 = vsel %vm1135_vm2, %v2059_v47, %v1134_v51 }
 0x51b   : > { %v972_v24 = vpop.f32.mrf.mxu0 }
 0x51e   : > { %v1077_v25 = vpop.f32.mrf.mxu3 }
 0x51f   : > { %v1080_v26 = vpack.c.bf16 %v1077_v25, %v1075_v23  ;;  %v1947_v23 = vld [vmem:[#allocation4 + $0x34] sm:$0xf]  ;;  %v1805_v25 = vld [vmem:[#allocation4 + $0x38] sm:$0xf0] }
 0x521   : > { %1776 = vmatmul.msk.bf16.vlgmr.msrb.gmra.mxu0 %vm710_vm0, %v1080_v26  ;;  %v1808_v26 = vor.u32 %v1947_v23, %v1805_v25  ;;  %v1967_v23 = vld [vmem:[#allocation6 + $0x50] sm:$0xff]  ;;  %v1966_v25 = vld [vmem:[#allocation6 + $0x48] sm:$0xff] }
 0x523   : > { %v974_v27 = vpop.f32.mrf.mxu0  ;;  %1304 = vmatpush.bf16.msrb.mxu2 %v1808_v26  ;;  %v1965_v26 = vld [vmem:[#allocation6 + $0x40] sm:$0xff] }
 0x524   : > { %v977_v28 = vpack.c.bf16 %v974_v27, %v972_v24  ;;  %v1804_v24 = vor.u32 %v1948_v22, %v1803_v21  ;;  %v1795_v27 = vld [vmem:[#allocation4 + $0x20] sm:$0xf]  ;;  %v1959_v21 = vld [vmem:[#allocation6 + $0x10] sm:$0xff]  ;;  %v1968_v22 = vld [vmem:[#allocation6 + $0x58] sm:$0xff] }
 0x526   : > { %1765 = vmatmul.msk.bf16.vlgmr.msra.gmra.mxu1 %vm710_vm0, %v977_v28  ;;  %v1946_v28 = vld [vmem:[#allocation4 + $0x24] sm:$0xf0] }
 0x527   : > { %1290 = vmatpush.bf16.msrb.mxu1 %v1804_v24  ;;  %v1796_v30 = vor.u32 %v1946_v28, %v1795_v27  ;;  %v1957_v24 = vld [vmem:[#allocation6] sm:$0xff] }
 0x528   : > { %v1200_v27 = vld [vmem:[%s2584_s8] sm:$0x3] }
 0x52b   : > { %1291 = vmatpush.bf16.msrb.mxu1 %v1796_v30 }
 0x59e   : > { %v1109_v33 = vpop.f32.mrf.mxu0 }
 0x5a3   : > { %v1006_v34 = vpop.f32.mrf.mxu1 }
 0x5a4   : > { %v1011_v35 = vadd.f32 %v1006_v34, %v906_v31  ;;  %v1797_v31 = vld [vmem:[#allocation4 + $0x28] sm:$0xf0]  ;;  %v1787_v34 = vld [vmem:[#allocation4 + $0x10] sm:$0xf] }
 0x5a6   : > { %v1114_v37 = vadd.f32 %v1109_v33, %v1011_v35  ;;  %v1111_v43 = vpop.f32.mrf.mxu0  ;;  %v1800_v33 = vor.u32 %v1945_v29, %v1797_v31  ;;  %v1944_v35 = vld [vmem:[#allocation4 + $0x14] sm:$0xf0]  ;;  %v1202_v29 = vperm.slane %v1200_v27, 0 }
 0x5a8   : > { %v1120_v38 = vadd.f32 %v2020_v36, %v1114_v37  ;;  %1305 = vmatpush.bf16.msrb.mxu2 %v1800_v33  ;;  %v1788_v37 = vor.u32 %v1944_v35, %v1787_v34  ;;  %v1203_v34 = vperm.slane %v1200_v27, 1 }
 0x5aa   : > { %v1122_v40 = vadd.f32 %v1120_v38, %v2441_v60  ;;  %v1789_v38 = vld [vmem:[#allocation4 + $0x18] sm:$0xf0]  ;;  %1292 = vmatpush.bf16.msrb.mxu1 %v1788_v37 }
 0x5ab   : > { %v1008_v41 = vpop.f32.mrf.mxu1 }
 0x5ac   : > { %v1012_v42 = vadd.f32 %v1008_v41, %v908_v39  ;;  %1126 = vadd.xlane.f32.xlu2 %v1122_v40  ;;  %v1942_v41 = vld [vmem:[#allocation4 + $0x4] sm:$0xf0] }
 0x5ae   : > { %v1115_v44 = vadd.f32 %v1111_v43, %v1012_v42  ;;  %v1941_v42 = vld [vmem:[#allocation4 + $0x4] sm:$0xf] }
 0x5b0   : > { %v1121_v45 = vadd.f32 %v2020_v36, %v1115_v44  ;;  %v1943_v36 = vld [vmem:[#allocation4 + $0x14] sm:$0xf] }
 0x5b1   : > { %v1792_v39 = vor.u32 %v1943_v36, %v1789_v38 }
 0x5b2   : > { %v1123_v14 = vadd.f32 %v1121_v45, %v2443_v63  ;;  %v1781_v45 = vld [vmem:[#allocation4 + $0x8] sm:$0xf0] }
 0x5b3   : > { %1306 = vmatpush.bf16.msrb.mxu2 %v1792_v39  ;;  %v1784_v46 = vor.u32 %v1941_v42, %v1781_v45  ;;  %v2023_v45 = vld [vmem:[%s2586_s10] ss:$0 sm:$0xff] }
 0x5b4   : > { %1128 = vadd.xlane.f32.xlu0 %v1123_v14 }
 0x5b7   : > { %1307 = vmatpush.bf16.msrb.mxu2 %v1784_v46 }
 0x61f   : > { %v1127_v60 = vpop.xlane.xlu2 %1126 }
 0x620   : > { %v1137_v52 = vmul.f32 %v2530_v18, %v1127_v60  ;;  %v1963_v60 = vld [vmem:[#allocation6 + $0x30] sm:$0xff] }
 0x621   : > { %1453 = vmatpush.bf16.msrb.mxu3 %v1963_v60 }
 0x622   : > { %v2533_v53 = vsub.f32 %v1122_v40, %v1137_v52  ;;  %v1779_v40 = vld [vmem:[#allocation4] sm:$0xf]  ;;  %v1971_v52 = vld [vmem:[#allocation6 + $0x70] sm:$0xff] }
 0x623   : > { %v1780_v44 = vor.u32 %v1942_v41, %v1779_v40  ;;  %1467 = vmatpush.bf16.msra.mxu0 %v1971_v52 }
 0x624   : > { %v1141_v54 = vmul.f32 %v2533_v53, %v2533_v53 }
 0x625   : > { %1293 = vmatpush.bf16.msrb.mxu1 %v1780_v44 }
 0x626   : > { %1143 = vadd.xlane.f32.xlu1 %v1141_v54 }
 0x627   : > { %v1129_v63 = vpop.xlane.xlu0 %1128  ;;  %1468 = vmatpush.bf16.msra.mxu0 %v1970_v58 }
 0x628   : > { %v1138_v55 = vmul.f32 %v2530_v18, %v1129_v63 }
 0x62a   : > { %v2538_v56 = vsub.f32 %v1123_v14, %v1138_v55 }
 0x62b   : > { %1469 = vmatpush.bf16.msra.mxu0 %v1969_v20 }
 0x62c   : > { %v1142_v57 = vmul.f32 %v2538_v56, %v2538_v56 }
 0x62e   : > { %1145 = vadd.xlane.f32.xlu2 %v1142_v57  ;;  %v1962_v57 = vld [vmem:[#allocation6 + $0x28] sm:$0xff] }
 0x62f   : > { %1454 = vmatpush.bf16.msrb.mxu3 %v1962_v57  ;;  %1470 = vmatpush.bf16.msra.mxu0 %v1968_v22 }
 0x633   : > { %1455 = vmatpush.bf16.msrb.mxu3 %v1961_v62  ;;  %1471 = vmatpush.bf16.msra.mxu0 %v1967_v23 }
 0x637   : > { %1472 = vmatpush.bf16.msra.mxu0 %v1966_v25 }
 0x63b   : > { %1473 = vmatpush.bf16.msra.mxu0 %v1965_v26 }
 0x699   : > { %v1144_v43 = vpop.xlane.xlu1 %1143 }
 0x69a   : > { %v1147_v14 = vmul.f32 %v1144_v43, %v2530_v18 }
 0x69c   : > { %v1149_v47 = vadd.f32 1e-05, %v1147_v14 }
 0x69e   : > { %2060 = vrsqrt.f32 %v1149_v47  ;;  %vm1157_vm4 = vweird.f32 %v1149_v47 }
 0x6a1   : > { %v1146_v50 = vpop.xlane.xlu2 %1145 }
 0x6a2   : > { %v1148_v51 = vmul.f32 %v1146_v50, %v2530_v18 }
 0x6a4   : > { %v2061_v54 = vpop.eup %2060  ;;  %v1150_v63 = vadd.f32 1e-05, %v1148_v51 }
 0x6a5   : > { %v1152_v55 = vmul.f32 %v2061_v54, %v1149_v47  ;;  %vm1158_vm3 = vweird.f32 %v2061_v54 }
 0x6a6   : > { %2062 = vrsqrt.f32 %v1150_v63  ;;  %vm1159_vm5 = vmor %vm1157_vm4, %vm1158_vm3  ;;  %vm1167_vm7 = vweird.f32 %v1150_v63 }
 0x6a7   : > { %v1153_v59 = vmul.f32 %v2061_v54, %v1152_v55 }
 0x6a9   : > { %v1154_v61 = vmul.f32 0.5, %v1153_v59 }
 0x6ab   : > { %v1155_v0 = vsub.f32 1.5, %v1154_v61 }
 0x6ac   : > { %v2063_v1 = vpop.eup %2062 }
 0x6ad   : > { %v1156_v2 = vmul.f32 %v2061_v54, %v1155_v0  ;;  %v1162_v3 = vmul.f32 %v2063_v1, %v1150_v63  ;;  %vm1168_vm6 = vweird.f32 %v2063_v1 }
 0x6ae   : > { %vm1169_vm8 = vmor %vm1167_vm7, %vm1168_vm6 }
 0x6af   : > { %v1163_v4 = vmul.f32 %v2063_v1, %v1162_v3  ;;  %v1160_v5 = vsel %vm1159_vm5, %v2061_v54, %v1156_v2 }
 0x6b0   : > { %v1171_v8 = vmul.f32 %v1160_v5, %v2533_v53  ;;  %v1960_v53 = vld [vmem:[#allocation6 + $0x18] sm:$0xff] }
 0x6b1   : > { %v1164_v6 = vmul.f32 0.5, %v1163_v4  ;;  %1456 = vmatpush.bf16.msrb.mxu3 %v1960_v53 }
 0x6b2   : > { %v1176_v12 = vmul.f32 %v2021_v9, %v1171_v8 }
 0x6b3   : > { %v1165_v7 = vsub.f32 1.5, %v1164_v6 }
 0x6b4   : > { %v1181_v16 = vadd.f32 %v2022_v13, %v1176_v12 }
 0x6b5   : > { %v1166_v32 = vmul.f32 %v2063_v1, %v1165_v7  ;;  %1457 = vmatpush.bf16.msrb.mxu3 %v1959_v21 }
 0x6b7   : > { %v1170_v10 = vsel %vm1169_vm8, %v2063_v1, %v1166_v32 }
 0x6b8   : > { %v1172_v11 = vmul.f32 %v1170_v10, %v2538_v56  ;;  %v1958_v56 = vld [vmem:[#allocation6 + $0x8] sm:$0xff] }
 0x6b9   : > { %1458 = vmatpush.bf16.msrb.mxu3 %v1958_v56 }
 0x6ba   : > { %v1177_v15 = vmul.f32 %v2021_v9, %v1172_v11 }
 0x6bc   : > { %v1182_v17 = vadd.f32 %v2022_v13, %v1177_v15  ;;  %v2024_v15 = vld [vmem:[%s2587_s11] ss:$0 sm:$0xff] }
 0x6bd   : > { %1459 = vmatpush.bf16.msrb.mxu3 %v1957_v24 }
 0x6be   : > { %v1183_v19 = vpack.c.bf16 %v1182_v17, %v1181_v16 }
 0x6c0   : > { %1294 = vmatmul.bf16.vlgmr.msrb.gmra.mxu1 %v1183_v19  ;;  %1308 = vmatmul.bf16.vlgmr.msrb.gmra.mxu2 %v1183_v19 }
 0x73d   : > { %v1295_v28 = vpop.f32.mrf.mxu1 }
 0x73e   : > { %v1296_v31 = vadd.f32 %v1295_v28, %v1202_v29 }
 0x740   : > { %v1314_v36 = vmax.f32 %v1296_v31, 0.0 }
 0x743   : > { %v1309_v30 = vpop.f32.mrf.mxu2 }
 0x744   : > { %v1310_v38 = vadd.f32 %v1309_v30, %v1203_v34 }
 0x745   : > { %v1297_v33 = vpop.f32.mrf.mxu1 }
 0x746   : > { %v1298_v35 = vadd.f32 %v1297_v33, %v1202_v29  ;;  %v1315_v42 = vmax.f32 %v1310_v38, 0.0 }
 0x748   : > { %v1316_v37 = vmax.f32 %v1298_v35, 0.0 }
 0x74a   : > { %v1318_v39 = vpack.c.bf16 %v1316_v37, %v1314_v36 }
 0x74b   : > { %v1311_v40 = vpop.f32.mrf.mxu2 }
 0x74c   : > { %v1312_v41 = vadd.f32 %v1311_v40, %v1203_v34  ;;  %1460 = vmatmul.bf16.vlgmr.msrb.gmra.mxu3 %v1318_v39 }
 0x74e   : > { %v1317_v43 = vmax.f32 %v1312_v41, 0.0 }
 0x750   : > { %v1319_v44 = vpack.c.bf16 %v1317_v43, %v1315_v42 }
 0x752   : > { %1474 = vmatmul.bf16.vlgmr.msra.gmra.mxu0 %v1319_v44 }
 0x7cf   : > { %v1461_v14 = vpop.f32.mrf.mxu3  ;;  %v1475_v46 = vpop.f32.mrf.mxu0 }
 0x7d0   : > { %v1462_v47 = vadd.f32 %v2023_v45, %v1461_v14 }
 0x7d2   : > { %v1476_v48 = vadd.f32 %v1475_v46, %v1462_v47 }
 0x7d4   : > { %v1480_v49 = vadd.f32 %v1476_v48, %v1181_v16 }
 0x7d6   : > { %1484 = vadd.xlane.f32.xlu2 %v1480_v49 }
 0x7d7   : > { %v1463_v50 = vpop.f32.mrf.mxu3  ;;  %v1477_v60 = vpop.f32.mrf.mxu0 }
 0x7d8   : > { %v1464_v51 = vadd.f32 %v2023_v45, %v1463_v50 }
 0x7da   : > { %v1478_v52 = vadd.f32 %v1477_v60, %v1464_v51 }
 0x7dc   : > { %v1481_v54 = vadd.f32 %v1478_v52, %v1182_v17  ;;  %v2025_v17 = vld [vmem:[%s2588_s12] ss:$0 sm:$0xff] }
 0x7de   : > { %1486 = vadd.xlane.f32.xlu2 %v1481_v54 }
 0x849   : > { %v1485_v63 = vpop.xlane.xlu2 %1484 }
 0x84a   : > { %v1488_v55 = vmul.f32 %v1485_v63, %v2530_v18 }
 0x84c   : > { %v1490_v57 = vsub.f32 %v1480_v49, %v1488_v55 }
 0x84e   : > { %v1492_v58 = vmul.f32 %v1490_v57, %v1490_v57 }
 0x850   : > { %1494 = vadd.xlane.f32.xlu0 %v1492_v58 }
 0x851   : > { %v1487_v59 = vpop.xlane.xlu2 %1486 }
 0x852   : > { %v1489_v61 = vmul.f32 %v1487_v59, %v2530_v18 }
 0x854   : > { %v1491_v62 = vsub.f32 %v1481_v54, %v1489_v61 }
 0x856   : > { %v1493_v0 = vmul.f32 %v1491_v62, %v1491_v62 }
 0x858   : > { %1496 = vadd.xlane.f32.xlu1 %v1493_v0 }
 0x8c3   : > { %v1495_v1 = vpop.xlane.xlu0 %1494 }
 0x8c4   : > { %v1498_v2 = vmul.f32 %v1495_v1, %v2530_v18 }
 0x8c6   : > { %v1500_v3 = vadd.f32 1e-05, %v1498_v2 }
 0x8c8   : > { %2064 = vrsqrt.f32 %v1500_v3  ;;  %vm1508_vm10 = vweird.f32 %v1500_v3 }
 0x8cb   : > { %v1497_v4 = vpop.xlane.xlu1 %1496 }
 0x8cc   : > { %v1499_v5 = vmul.f32 %v1497_v4, %v2530_v18 }
 0x8ce   : > { %v2065_v6 = vpop.eup %2064  ;;  %v1501_v7 = vadd.f32 1e-05, %v1499_v5 }
 0x8cf   : > { %v1503_v8 = vmul.f32 %v2065_v6, %v1500_v3  ;;  %vm1509_vm9 = vweird.f32 %v2065_v6 }
 0x8d0   : > { %2066 = vrsqrt.f32 %v1501_v7  ;;  %vm1510_vm11 = vmor %vm1508_vm10, %vm1509_vm9  ;;  %vm1518_vm13 = vweird.f32 %v1501_v7 }
 0x8d1   : > { %v1504_v9 = vmul.f32 %v2065_v6, %v1503_v8 }
 0x8d3   : > { %v1505_v32 = vmul.f32 0.5, %v1504_v9 }
 0x8d5   : > { %v1506_v10 = vsub.f32 1.5, %v1505_v32 }
 0x8d6   : > { %v2067_v11 = vpop.eup %2066 }
 0x8d7   : > { %v1507_v12 = vmul.f32 %v2065_v6, %v1506_v10  ;;  %v1513_v13 = vmul.f32 %v2067_v11, %v1501_v7  ;;  %vm1519_vm12 = vweird.f32 %v2067_v11 }
 0x8d8   : > { %vm1520_vm14 = vmor %vm1518_vm13, %vm1519_vm12 }
 0x8d9   : > { %v1511_v16 = vsel %vm1510_vm11, %v2065_v6, %v1507_v12  ;;  %v1514_v18 = vmul.f32 %v2067_v11, %v1513_v13 }
 0x8da   : > { %v1522_v19 = vmul.f32 %v1511_v16, %v1490_v57 }
 0x8db   : > { %v1515_v53 = vmul.f32 0.5, %v1514_v18 }
 0x8dc   : > { %v1527_v20 = vmul.f32 %v2024_v15, %v1522_v19 }
 0x8dd   : > { %v1516_v21 = vsub.f32 1.5, %v1515_v53 }
 0x8de   : > { %v1532_v22 = vadd.f32 %v2025_v17, %v1527_v20 }
 0x8df   : > { %v1517_v56 = vmul.f32 %v2067_v11, %v1516_v21 }
 0x8e0   : > { %1534 = vst [vmem:[%s490_s14] sm:$0xff] %v1532_v22 }
 0x8e1   : > { %v1521_v23 = vsel %vm1520_vm14, %v2067_v11, %v1517_v56 }
 0x8e2   : > { %v1523_v24 = vmul.f32 %v1521_v23, %v1491_v62 }
 0x8e4   : > { %v1528_v25 = vmul.f32 %v2024_v15, %v1523_v24 }
 0x8e6   : > { %v1533_v26 = vadd.f32 %v2025_v17, %v1528_v25 }
 0x8e8   : > { %1535 = vst [vmem:[%s490_s14 + $0x8] sm:$0xff] %v1533_v26 }
 0x8e9 PF: > { %s25_s25 = sadd.s32 1, %s2172_s25  }
 0x8ea   : > { %p22_p7 = scmp.ge.s32.totalorder %s25_s25, 4  }
 0x8ec   :  { %24 = sbr.rel (!%p22_p7) target bundleno = 4 (0x4), region = 115 }
 0x8f1   :  { %1557 = vsyncpa [#allocation3], 1 }
 0x8f2   :  { %1559 = vsyncpa [#allocation3 + $0x1], 1 }
 0x8f3   :  { %1560 = vsyncpa [#allocation5], 1 }

// kernel: et_bert_forward.5
= control target key start
LH: loop header
LB: loop body
LE: loop exit
PB: predicated region body
PF: predicated region fallthrough
CT: control target
= control target key end

     0   :  { %10 = vsyncpa [#allocation3], 0  ;;  %s3514_s0 = inlined_call_operand.vmem [shape: f32[2,16,128], index: 0, kind: input, shape index: {}]   ;;  %s3515_s1 = inlined_call_operand.hbm [shape: bf16[128,768], index: 1, kind: input, shape index: {}]   ;;  %s3516_s2 = inlined_call_operand.vmem [shape: f32[1,256], index: 2, kind: input, shape index: {}]   ;;  %s3517_s3 = inlined_call_operand.hbm [shape: bf16[8,256,128], index: 3, kind: input, shape index: {}]   ;;  %s3518_s4 = inlined_call_operand.hbm [shape: f32[1,128], index: 4, kind: input, shape index: {}]   ;;  %s3519_s5 = inlined_call_operand.hbm [shape: f32[2,1,128], index: 5, kind: output, shape index: {}]  }
   0x1   :  { %11 = vsyncpa [#allocation6], 0 }
   0x2   :  { %12 = vsyncpa [#allocation4], 0 }
   0x3   :  { %14 = vsyncpa [#allocation4 + $0x1], 0  ;;  %s3322_s18 = smov 0   ;;  %s3324_s19 = smov 0  }
   0x4   :  { %s3326_s20 = smov 0   ;;  %s3328_s21 = smov 0  }
   0x5 LB: > { %s3343_s22 = sadd.s32 4294967295, %s3282_s21   ;;  %s2149_s23 = sadd.s32 4294967294, %s3282_s21   ;;  %s3282_s21 = sphi %s3328_s21, %s3527_s21   ;;  %s3278_s20 = sphi %s3326_s20, %s3526_s20   ;;  %s3274_s19 = sphi %s3324_s19, %s3525_s19   ;;  %s3270_s18 = sphi %s3322_s18, %s3524_s18  }
   0x6   : > { %s3347_s24 = sadd.s32 1, %s3282_s21   ;;  %s137_s25 = sadd.s32 1, %s3278_s20 }
   0x7   : > { %s134_s26 = ssub.s32 %s3282_s21, %s3347_s24  ;;  %p147_p0 = scmp.ne.s32.totalorder %s3278_s20, %s3274_s19 }
   0x8   : > { %p135_p1 = scmp.eq.s32.totalorder %s134_s26, 0  ;;  %p148_p2 = scmp.eq.s32.totalorder %s3343_s22, 1 }
   0x9   : > { %p153_p3 = scmp.ne.s32.totalorder %s3274_s19, %s3270_s18  ;;  %p154_p4 = scmp.eq.s32.totalorder %s2149_s23, 1 }
   0xa   : > { %s3358_s27 = scalar_select %p135_p1, %s3278_s20, %s137_s25  }
   0xb   : > { %p3360_p5 = por %p148_p2, %p147_p0  ;;  %p3364_p6 = por %p154_p4, %p153_p3 }
   0xc   : > { %p2150_p7 = scmp.ge.s32.totalorder %s3282_s21, 1  ;;  %p161_p8 = scmp.lt.s32.totalorder %s3282_s21, 3 }
   0xd   : > { %p3075_p9 = scmp.eq.s32.totalorder %s3343_s22, 0  ;;  %s189_s8 = sshll.u32 %s3517_s3, 4  ;;  %s190_s8 = int_to_ptr.hbm [resolvable:$true] %s189_s8 }
   0xe   : > { %p3371_p10 = pnand %p2150_p7, %p161_p8  ;;  %s3284_s9 = smov [#allocation5]  }
   0xf   : > { %s191_s10 = sshll.u32 %s3284_s9, 4  ;;  %s172_s14 = sshll.u32 %s3515_s1, 4  ;;  %s192_s10 = int_to_ptr.vmem [resolvable:$true] %s191_s10  ;;  %s173_s14 = int_to_ptr.hbm [resolvable:$true] %s172_s14 }
  0x10   : > { %p3061_p11 = pneg %p3371_p10  ;;  %s3285_s15 = smov 64  }
  0x11   : > { %s3286_s16 = smov 4   ;;  %s3287_s17 = smov [#allocation2]  }
  0x12   : > { %p3382_p12 = pnand %p3075_p9, %p3061_p11  ;;  %s174_s23 = sshll.u32 %s3287_s17, 4  ;;  %s175_s23 = int_to_ptr.vmem [resolvable:$true] %s174_s23 }
  0x13   : > { %s3288_s25 = smov 384   ;;  %s3289_s26 = smov 24  }
  0x14   : > { %3067 = dma.hbm_to_vmem [thread:$0]  (!%p3382_p12), %s190_s8, 16384, %s192_s10, [#allocation6], %s3285_s15, %s3285_s15, %s3286_s16  }
  0x15   : > { %3064 = dma.hbm_to_vmem [thread:$0]  (!%p3382_p12), %s173_s14, 6144, %s175_s23, [#allocation3], %s3288_s25, %s3288_s25, %s3289_s26  }
  0x16   : > { %s204_s9 = sshll.u32 %s3518_s4, 4  ;;  %s3290_s12 = smov [#allocation7]   ;;  %s205_s9 = int_to_ptr.hbm [resolvable:$true] %s204_s9 }
  0x17   : > { %s206_s13 = sshll.u32 %s3290_s12, 4  ;;  %227 = sbr.rel (%p3371_p10) target bundleno = 597 (0x255), region = 40  ;;  %s207_s13 = int_to_ptr.vmem [resolvable:$true] %s206_s13 }
  0x18   : > { %3070 = dma.hbm_to_vmem [thread:$0]  (!%p3382_p12), %s205_s9, 16, %s207_s13, [#allocation6]  }
  0x1c   : > { %3257 = dma.done.wait (%p3075_p9), [#allocation3], 6144  }
  0x1d   : > { %3259 = vsyncadd (%p3075_p9), [#allocation3], 4294961152 }
  0x1e   : > { %3261 = dma.done.wait (%p3075_p9), [#allocation6], 16400  }
  0x1f   : > { %3263 = vsyncadd (%p3075_p9), [#allocation6], 4294950896  ;;  %v2331_v0 = vld [vmem:[#allocation2 + $0x150] sm:$0xf]  ;;  %v2916_v1 = vld [vmem:[#allocation2 + $0x164] sm:$0xf0]  ;;  %s2059_s26 = scalar_lea.hbm %s3519_s5, %s3343_s22 }
  0x20   : > { %v2913_v2 = vld [vmem:[#allocation2 + $0x154] sm:$0xf]  ;;  %v2332_v3 = vor.u32 %v2916_v1, %v2331_v0  ;;  %v2333_v4 = vld [vmem:[#allocation2 + $0x168] sm:$0xf0]  ;;  %v2339_v5 = vld [vmem:[#allocation2 + $0x158] sm:$0xf] }
  0x21   : > { %v2917_v6 = vld [vmem:[#allocation2 + $0x16c] sm:$0xf0]  ;;  %v2336_v7 = vor.u32 %v2913_v2, %v2333_v4  ;;  %v2914_v9 = vld [vmem:[#allocation2 + $0x15c] sm:$0xf]  ;;  %v2341_v10 = vld [vmem:[#allocation2 + $0x170] sm:$0xf0] }
  0x22   : > { %v2340_v8 = vor.u32 %v2917_v6, %v2339_v5  ;;  %v2307_v11 = vld [vmem:[#allocation2 + $0x120] sm:$0xf]  ;;  %561 = vmatpush.bf16.msra.mxu0 %v2332_v3  ;;  %v2344_v12 = vor.u32 %v2914_v9, %v2341_v10  ;;  %v2910_v13 = vld [vmem:[#allocation2 + $0x134] sm:$0xf0]  ;;  %v2907_v14 = vld [vmem:[#allocation2 + $0x124] sm:$0xf] }
  0x23   : > { %v2309_v15 = vld [vmem:[#allocation2 + $0x138] sm:$0xf0]  ;;  %575 = vmatpush.bf16.msra.mxu1 %v2336_v7  ;;  %v2308_v16 = vor.u32 %v2910_v13, %v2307_v11  ;;  %v2315_v18 = vld [vmem:[#allocation2 + $0x128] sm:$0xf]  ;;  %v2911_v19 = vld [vmem:[#allocation2 + $0x13c] sm:$0xf0] }
  0x24   : > { %589 = vmatpush.bf16.msra.mxu2 %v2340_v8  ;;  %v2312_v17 = vor.u32 %v2907_v14, %v2309_v15  ;;  %v2908_v20 = vld [vmem:[#allocation2 + $0x12c] sm:$0xf]  ;;  %603 = vmatpush.bf16.msra.mxu3 %v2344_v12  ;;  %v2316_v21 = vor.u32 %v2911_v19, %v2315_v18  ;;  %v2317_v22 = vld [vmem:[#allocation2 + $0x140] sm:$0xf0]  ;;  %v2283_v23 = vld [vmem:[#allocation2 + $0xf0] sm:$0xf] }
  0x25   : > { %v2904_v24 = vld [vmem:[#allocation2 + $0x104] sm:$0xf0]  ;;  %v2320_v25 = vor.u32 %v2908_v20, %v2317_v22  ;;  %v2901_v26 = vld [vmem:[#allocation2 + $0xf4] sm:$0xf]  ;;  %v2285_v27 = vld [vmem:[#allocation2 + $0x108] sm:$0xf0] }
  0x26   : > { %v2291_v28 = vld [vmem:[#allocation2 + $0xf8] sm:$0xf]  ;;  %562 = vmatpush.bf16.msra.mxu0 %v2308_v16  ;;  %v2284_v29 = vor.u32 %v2904_v24, %v2283_v23  ;;  %v2905_v30 = vld [vmem:[#allocation2 + $0x10c] sm:$0xf0]  ;;  %v2902_v31 = vld [vmem:[#allocation2 + $0xfc] sm:$0xf]  ;;  %v2288_v33 = vor.u32 %v2901_v26, %v2285_v27 }
  0x27   : > { %v2293_v32 = vld [vmem:[#allocation2 + $0x110] sm:$0xf0]  ;;  %576 = vmatpush.bf16.msra.mxu1 %v2312_v17  ;;  %v2292_v34 = vor.u32 %v2905_v30, %v2291_v28  ;;  %v2259_v35 = vld [vmem:[#allocation2 + $0xc0] sm:$0xf]  ;;  %v2898_v36 = vld [vmem:[#allocation2 + $0xd4] sm:$0xf0] }
  0x28   : > { %590 = vmatpush.bf16.msra.mxu2 %v2316_v21  ;;  %v2895_v37 = vld [vmem:[#allocation2 + $0xc4] sm:$0xf]  ;;  %604 = vmatpush.bf16.msra.mxu3 %v2320_v25  ;;  %v2296_v38 = vor.u32 %v2902_v31, %v2293_v32  ;;  %v2261_v39 = vld [vmem:[#allocation2 + $0xd8] sm:$0xf0]  ;;  %v2267_v40 = vld [vmem:[#allocation2 + $0xc8] sm:$0xf]  ;;  %v2260_v44 = vor.u32 %v2898_v36, %v2259_v35 }
  0x29   : > { %v2899_v41 = vld [vmem:[#allocation2 + $0xdc] sm:$0xf0]  ;;  %v2896_v42 = vld [vmem:[#allocation2 + $0xcc] sm:$0xf]  ;;  %v2269_v43 = vld [vmem:[#allocation2 + $0xe0] sm:$0xf0]  ;;  %v2264_v45 = vor.u32 %v2895_v37, %v2261_v39 }
  0x2a   : > { %563 = vmatpush.bf16.msra.mxu0 %v2284_v29  ;;  %v2268_v46 = vor.u32 %v2899_v41, %v2267_v40  ;;  %v2235_v47 = vld [vmem:[#allocation2 + $0x90] sm:$0xf]  ;;  %v2892_v48 = vld [vmem:[#allocation2 + $0xa4] sm:$0xf0]  ;;  %v2889_v49 = vld [vmem:[#allocation2 + $0x94] sm:$0xf]  ;;  %v2272_v50 = vor.u32 %v2896_v42, %v2269_v43 }
  0x2b   : > { %577 = vmatpush.bf16.msra.mxu1 %v2288_v33  ;;  %v2237_v51 = vld [vmem:[#allocation2 + $0xa8] sm:$0xf0]  ;;  %v2243_v52 = vld [vmem:[#allocation2 + $0x98] sm:$0xf]  ;;  %v2893_v53 = vld [vmem:[#allocation2 + $0xac] sm:$0xf0]  ;;  %v2236_v56 = vor.u32 %v2892_v48, %v2235_v47 }
  0x2c   : > { %591 = vmatpush.bf16.msra.mxu2 %v2292_v34  ;;  %605 = vmatpush.bf16.msra.mxu3 %v2296_v38  ;;  %v2890_v54 = vld [vmem:[#allocation2 + $0x9c] sm:$0xf]  ;;  %v2245_v55 = vld [vmem:[#allocation2 + $0xb0] sm:$0xf0]  ;;  %p265_p13 = scmp.lt.s32.totalorder %s3343_s22, 1  ;;  %v2240_v57 = vor.u32 %v2889_v49, %v2237_v51  ;;  %v2244_v58 = vor.u32 %v2893_v53, %v2243_v52  ;;  %vm718_vm5 = vcmask 130048  }
  0x2d   : > { %v2211_v59 = vld [vmem:[#allocation2 + $0x60] sm:$0xf]  ;;  %v2886_v60 = vld [vmem:[#allocation2 + $0x74] sm:$0xf0]  ;;  %v2883_v61 = vld [vmem:[#allocation2 + $0x64] sm:$0xf]  ;;  %v2248_v62 = vor.u32 %v2890_v54, %v2245_v55 }
  0x2e   : > { %564 = vmatpush.bf16.msra.mxu0 %v2260_v44  ;;  %v2213_v63 = vld [vmem:[#allocation2 + $0x78] sm:$0xf0]  ;;  %v2219_v0 = vld [vmem:[#allocation2 + $0x68] sm:$0xf]  ;;  %v2887_v1 = vld [vmem:[#allocation2 + $0x7c] sm:$0xf0]  ;;  %v2212_v4 = vor.u32 %v2886_v60, %v2211_v59 }
  0x2f   : > { %578 = vmatpush.bf16.msra.mxu1 %v2264_v45  ;;  %v2884_v2 = vld [vmem:[#allocation2 + $0x6c] sm:$0xf]  ;;  %v2221_v3 = vld [vmem:[#allocation2 + $0x80] sm:$0xf0]  ;;  %s3412_s30 = scalar_select %p265_p13, %s3343_s22, 1  ;;  %v2216_v5 = vor.u32 %v2883_v61, %v2213_v63  ;;  %v2220_v6 = vor.u32 %v2887_v1, %v2219_v0 }
  0x30   : > { %592 = vmatpush.bf16.msra.mxu2 %v2268_v46  ;;  %606 = vmatpush.bf16.msra.mxu3 %v2272_v50  ;;  %v2187_v7 = vld [vmem:[#allocation2 + $0x30] sm:$0xf]  ;;  %v2880_v8 = vld [vmem:[#allocation2 + $0x44] sm:$0xf0]  ;;  %v2877_v9 = vld [vmem:[#allocation2 + $0x34] sm:$0xf]  ;;  %v2224_v10 = vor.u32 %v2884_v2, %v2221_v3 }
  0x31   : > { %v2189_v11 = vld [vmem:[#allocation2 + $0x48] sm:$0xf0]  ;;  %v2195_v12 = vld [vmem:[#allocation2 + $0x38] sm:$0xf]  ;;  %v2881_v13 = vld [vmem:[#allocation2 + $0x4c] sm:$0xf0]  ;;  %v2188_v16 = vor.u32 %v2880_v8, %v2187_v7 }
  0x32   : > { %565 = vmatpush.bf16.msra.mxu0 %v2236_v56  ;;  %v2878_v14 = vld [vmem:[#allocation2 + $0x3c] sm:$0xf]  ;;  %v2197_v15 = vld [vmem:[#allocation2 + $0x50] sm:$0xf0]  ;;  %s2870_s8 = sshll.u32 %s3412_s30, 4  ;;  %v2192_v18 = vor.u32 %v2877_v9, %v2189_v11  ;;  %v2196_v19 = vor.u32 %v2881_v13, %v2195_v12  ;;  %s263_s17 = sand.u32 1, %s3274_s19  }
  0x33   : > { %579 = vmatpush.bf16.msra.mxu1 %v2240_v57  ;;  %v2163_v17 = vld [vmem:[#allocation2] sm:$0xf]  ;;  %v2874_v20 = vld [vmem:[#allocation2 + $0x14] sm:$0xf0]  ;;  %v2871_v21 = vld [vmem:[#allocation2 + $0x4] sm:$0xf]  ;;  %v2200_v23 = vor.u32 %v2878_v14, %v2197_v15  ;;  %s269_s14 = scalar_lea.vmem %s3514_s0, %s2870_s8 }
  0x34   : > { %593 = vmatpush.bf16.msra.mxu2 %v2244_v58  ;;  %607 = vmatpush.bf16.msra.mxu3 %v2248_v62  ;;  %v2165_v22 = vld [vmem:[#allocation2 + $0x18] sm:$0xf0]  ;;  %v2347_v24 = vld [vmem:[#allocation2 + $0x160] sm:$0xf]  ;;  %v2918_v25 = vld [vmem:[#allocation2 + $0x174] sm:$0xf0]  ;;  %v2164_v30 = vor.u32 %v2874_v20, %v2163_v17 }
  0x35   : > { %v2915_v26 = vld [vmem:[#allocation2 + $0x164] sm:$0xf]  ;;  %v2349_v27 = vld [vmem:[#allocation2 + $0x178] sm:$0xf0]  ;;  %v2171_v28 = vld [vmem:[#allocation2 + $0x8] sm:$0xf]  ;;  %v2168_v33 = vor.u32 %v2871_v21, %v2165_v22  ;;  %v2348_v34 = vor.u32 %v2918_v25, %v2347_v24  ;;  %v645_v22 = vlaneseq }
  0x36   : > { %566 = vmatpush.bf16.msra.mxu0 %v2212_v4  ;;  %v2875_v29 = vld [vmem:[#allocation2 + $0x1c] sm:$0xf0]  ;;  %v2872_v31 = vld [vmem:[#allocation2 + $0xc] sm:$0xf]  ;;  %v2173_v32 = vld [vmem:[#allocation2 + $0x20] sm:$0xf0]  ;;  %v2352_v36 = vor.u32 %v2915_v26, %v2349_v27 }
  0x37   : > { %580 = vmatpush.bf16.msra.mxu1 %v2216_v5  ;;  %v270_v35 = vld [vmem:[%s269_s14] sm:$0xff]  ;;  %v2172_v37 = vor.u32 %v2875_v29, %v2171_v28  ;;  %v271_v38 = vld [vmem:[%s269_s14 + $0x8] sm:$0xff]  ;;  %v2323_v39 = vld [vmem:[#allocation2 + $0x130] sm:$0xf]  ;;  %v2176_v41 = vor.u32 %v2872_v31, %v2173_v32  ;;  %v3419_v27 = vshrl.u32 %v645_v22, 7  ;;  %s264_s6 = scalar_lea.vmem [#allocation8], %s263_s17 }
  0x38   : > { %594 = vmatpush.bf16.msra.mxu2 %v2220_v6  ;;  %608 = vmatpush.bf16.msra.mxu3 %v2224_v10  ;;  %v2912_v40 = vld [vmem:[#allocation2 + $0x144] sm:$0xf0]  ;;  %v2909_v42 = vld [vmem:[#allocation2 + $0x134] sm:$0xf]  ;;  %v2325_v43 = vld [vmem:[#allocation2 + $0x148] sm:$0xf0]  ;;  %v272_v44 = vpack.c.bf16 %v271_v38, %v270_v35 }
  0x39   : > { %v2324_v45 = vor.u32 %v2912_v40, %v2323_v39  ;;  %v2328_v46 = vor.u32 %v2909_v42, %v2325_v43  ;;  %v2299_v47 = vld [vmem:[#allocation2 + $0x100] sm:$0xf]  ;;  %v2906_v48 = vld [vmem:[#allocation2 + $0x114] sm:$0xf0]  ;;  %v2903_v49 = vld [vmem:[#allocation2 + $0x104] sm:$0xf] }
  0x3a   : > { %567 = vmatpush.bf16.msra.mxu0 %v2188_v16  ;;  %v2301_v50 = vld [vmem:[#allocation2 + $0x118] sm:$0xf0]  ;;  %v2300_v51 = vor.u32 %v2906_v48, %v2299_v47  ;;  %v2275_v53 = vld [vmem:[#allocation2 + $0xd0] sm:$0xf]  ;;  %v2900_v54 = vld [vmem:[#allocation2 + $0xe4] sm:$0xf0] }
  0x3b   : > { %581 = vmatpush.bf16.msra.mxu1 %v2192_v18  ;;  %v2304_v52 = vor.u32 %v2903_v49, %v2301_v50  ;;  %v2897_v55 = vld [vmem:[#allocation2 + $0xd4] sm:$0xf]  ;;  %v2277_v56 = vld [vmem:[#allocation2 + $0xe8] sm:$0xf0]  ;;  %v2276_v57 = vor.u32 %v2900_v54, %v2275_v53  ;;  %v2251_v59 = vld [vmem:[#allocation2 + $0xa0] sm:$0xf] }
  0x3c   : > { %595 = vmatpush.bf16.msra.mxu2 %v2196_v19  ;;  %609 = vmatpush.bf16.msra.mxu3 %v2200_v23  ;;  %v2280_v58 = vor.u32 %v2897_v55, %v2277_v56  ;;  %v2894_v60 = vld [vmem:[#allocation2 + $0xb4] sm:$0xf0]  ;;  %v2891_v61 = vld [vmem:[#allocation2 + $0xa4] sm:$0xf]  ;;  %v2253_v62 = vld [vmem:[#allocation2 + $0xb8] sm:$0xf0] }
  0x3d   : > { %v2252_v63 = vor.u32 %v2894_v60, %v2251_v59  ;;  %v2256_v0 = vor.u32 %v2891_v61, %v2253_v62  ;;  %v2227_v1 = vld [vmem:[#allocation2 + $0x70] sm:$0xf]  ;;  %v2888_v2 = vld [vmem:[#allocation2 + $0x84] sm:$0xf0]  ;;  %v2885_v3 = vld [vmem:[#allocation2 + $0x74] sm:$0xf] }
  0x3e   : > { %568 = vmatpush.bf16.msra.mxu0 %v2164_v30  ;;  %v2229_v4 = vld [vmem:[#allocation2 + $0x88] sm:$0xf0]  ;;  %v2228_v5 = vor.u32 %v2888_v2, %v2227_v1  ;;  %v2203_v7 = vld [vmem:[#allocation2 + $0x40] sm:$0xf]  ;;  %v2882_v8 = vld [vmem:[#allocation2 + $0x54] sm:$0xf0] }
  0x3f   : > { %582 = vmatpush.bf16.msra.mxu1 %v2168_v33  ;;  %v2232_v6 = vor.u32 %v2885_v3, %v2229_v4  ;;  %v2879_v9 = vld [vmem:[#allocation2 + $0x44] sm:$0xf]  ;;  %v2205_v10 = vld [vmem:[#allocation2 + $0x58] sm:$0xf0]  ;;  %v2204_v11 = vor.u32 %v2882_v8, %v2203_v7  ;;  %v2179_v13 = vld [vmem:[#allocation2 + $0x10] sm:$0xf] }
  0x40   : > { %596 = vmatpush.bf16.msra.mxu2 %v2172_v37  ;;  %610 = vmatpush.bf16.msra.mxu3 %v2176_v41  ;;  %v2208_v12 = vor.u32 %v2879_v9, %v2205_v10  ;;  %v2876_v14 = vld [vmem:[#allocation2 + $0x24] sm:$0xf0]  ;;  %v2873_v15 = vld [vmem:[#allocation2 + $0x14] sm:$0xf]  ;;  %v2181_v16 = vld [vmem:[#allocation2 + $0x28] sm:$0xf0] }
  0x41   : > { %569 = vmatmul.bf16.vlgmr.msra.gmra.mxu0 %v272_v44  ;;  %v2180_v17 = vor.u32 %v2876_v14, %v2179_v13  ;;  %v2184_v18 = vor.u32 %v2873_v15, %v2181_v16  ;;  %v2926_v24 = vld [vmem:[#allocation5 + $0x38] sm:$0xff]  ;;  %v2925_v29 = vld [vmem:[#allocation5 + $0x30] sm:$0xff]  ;;  %vm654_vm0 = vcmp.lt.s32.totalorder %v3419_v27, 1  ;;  %v2924_v37 = vld [vmem:[#allocation5 + $0x28] sm:$0xff]  ;;  %vm648_vm1 = vcmp.gt.s32.totalorder %v3419_v27, 0  ;;  %s2061_s7 = sshll.u32 %s264_s6, 4  ;;  %s2062_s7 = int_to_ptr.vmem [resolvable:$true] %s2061_s7 }
  0x42   : > { %617 = vmatpush.bf16.msrb.mxu0 %v2348_v34  ;;  %583 = vmatmul.bf16.vlgmr.msra.gmra.mxu1 %v272_v44  ;;  %v2934_v25 = vld [vmem:[#allocation5 + $0x78] sm:$0xff]  ;;  %v2933_v30 = vld [vmem:[#allocation5 + $0x70] sm:$0xff]  ;;  %v2932_v38 = vld [vmem:[#allocation5 + $0x68] sm:$0xff]  ;;  %v647_v41 = vadd.s32 8, %v3419_v27  ;;  %vm673_vm3 = vcmp.lt.s32.totalorder %v3419_v27, 7  ;;  %s2063_s9 = sshll.u32 %s2059_s26, 4  ;;  %s2064_s9 = int_to_ptr.hbm [resolvable:$true] %s2063_s9 }
  0x43   : > { %631 = vmatpush.bf16.msrb.mxu1 %v2352_v36  ;;  %597 = vmatmul.bf16.vlgmr.msra.gmra.mxu2 %v272_v44  ;;  %v686_v42 = vld [vmem:[%s3516_s2] sm:$0x3]  ;;  %v2922_v61 = vld [vmem:[#allocation5 + $0x18] sm:$0xff]  ;;  %v2929_v13 = vld [vmem:[#allocation5 + $0x50] sm:$0xff]  ;;  %s2051_s12 = scalar_lea.sflag [#allocation4], %s263_s17  ;;  %s3226_s13 = sshra.s32 %s2064_s9, 4  ;;  %s3227_s13 = int_to_ptr.hbm [resolvable:$true] %s3226_s13 }
  0x44   : > { %611 = vmatmul.bf16.vlgmr.msra.gmra.mxu3 %v272_v44  ;;  %v2923_v43 = vld [vmem:[#allocation5 + $0x20] sm:$0xff]  ;;  %vm668_vm2 = vcmp.lt.s32.totalorder %v647_v41, 15  ;;  %v688_v55 = vperm.slane %v686_v42, 0  ;;  %v689_v56 = vperm.slane %v686_v42, 1  ;;  %v2930_v62 = vld [vmem:[#allocation5 + $0x58] sm:$0xff]  ;;  %s3228_s30 = scalar_lea.hbm %s3227_s13, 1  ;;  %p3233_p3 = scmp.lt.s32.totalorder %s3227_s13, %s3519_s5 }
  0x45   : > { %v2950_v42 = vld [vmem:[#allocation5 + $0xf8] sm:$0xff]  ;;  %p3229_p0 = scmp.ne.s32.totalorder %s3227_s13, %s3228_s30  ;;  %s3232_s10 = scalar_lea.hbm %s3519_s5, 2 }
  0x46   : > { %618 = vmatpush.bf16.msrb.mxu0 %v2324_v45  ;;  %p3234_p4 = scmp.lt.s32.totalorder %s3232_s10, %s3228_s30 }
  0x47   : > { %632 = vmatpush.bf16.msrb.mxu1 %v2328_v46  ;;  %p3230_p1 = pnand %p3229_p0, %p3360_p5 }
  0x48   : > { %p3235_p7 = por %p3234_p4, %p3233_p3 }
  0x49   : > { %p3231_p2 = pneg %p3230_p1 }
  0x4a   : > { %619 = vmatpush.bf16.msrb.mxu0 %v2300_v51 }
  0x4b   : > { %633 = vmatpush.bf16.msrb.mxu1 %v2304_v52  ;;  %p3236_p8 = pnand %p3235_p7, %p3231_p2 }
  0x4e   : > { %620 = vmatpush.bf16.msrb.mxu0 %v2276_v57 }
  0x4f   : > { %634 = vmatpush.bf16.msrb.mxu1 %v2280_v58 }
  0x52   : > { %621 = vmatpush.bf16.msrb.mxu0 %v2252_v63 }
  0x53   : > { %635 = vmatpush.bf16.msrb.mxu1 %v2256_v0 }
  0x56   : > { %622 = vmatpush.bf16.msrb.mxu0 %v2228_v5 }
  0x57   : > { %636 = vmatpush.bf16.msrb.mxu1 %v2232_v6 }
  0x5a   : > { %623 = vmatpush.bf16.msrb.mxu0 %v2204_v11 }
  0x5b   : > { %637 = vmatpush.bf16.msrb.mxu1 %v2208_v12  ;;  %v2921_v12 = vld [vmem:[#allocation5 + $0x10] sm:$0xff] }
  0x5e   : > { %624 = vmatpush.bf16.msrb.mxu0 %v2180_v17 }
  0x5f   : > { %638 = vmatpush.bf16.msrb.mxu1 %v2184_v18 }
  0x61   : > { %625 = vmatmul.bf16.vlgmr.msrb.gmra.mxu0 %v272_v44 }
  0x62   : > { %639 = vmatmul.bf16.vlgmr.msrb.gmra.mxu1 %v272_v44  ;;  %1061 = vmatpush.bf16.msra.mxu0 %v2926_v24  ;;  %v2931_v44 = vld [vmem:[#allocation5 + $0x60] sm:$0xff] }
  0x63   : > { %1074 = vmatpush.bf16.msra.mxu1 %v2934_v25  ;;  %v2920_v25 = vld [vmem:[#allocation5 + $0x8] sm:$0xff] }
  0x66   : > { %1062 = vmatpush.bf16.msra.mxu0 %v2925_v29  ;;  %v2928_v29 = vld [vmem:[#allocation5 + $0x48] sm:$0xff] }
  0x67   : > { %1075 = vmatpush.bf16.msra.mxu1 %v2933_v30 }
  0x6a   : > { %1063 = vmatpush.bf16.msra.mxu0 %v2924_v37 }
  0x6b   : > { %1076 = vmatpush.bf16.msra.mxu1 %v2932_v38  ;;  %v3291_v38 = vmov 0.0  }
  0x6e   : > { %1064 = vmatpush.bf16.msra.mxu0 %v2923_v43  ;;  %v2927_v43 = vld [vmem:[#allocation5 + $0x40] sm:$0xff] }
  0x6f   : > { %1077 = vmatpush.bf16.msra.mxu1 %v2931_v44  ;;  %v2974_v44 = vld [vmem:[#allocation5 + $0x1b8] sm:$0xff] }
  0x72   : > { %1065 = vmatpush.bf16.msra.mxu0 %v2922_v61  ;;  %v2937_v61 = vld [vmem:[#allocation5 + $0x90] sm:$0xff] }
  0x73   : > { %1078 = vmatpush.bf16.msra.mxu1 %v2930_v62  ;;  %v2945_v62 = vld [vmem:[#allocation5 + $0xd0] sm:$0xff] }
  0x76   : > { %1066 = vmatpush.bf16.msra.mxu0 %v2921_v12  ;;  %v2963_v12 = vld [vmem:[#allocation5 + $0x160] sm:$0xff] }
  0x77   : > { %1079 = vmatpush.bf16.msra.mxu1 %v2929_v13  ;;  %v2954_v13 = vld [vmem:[#allocation5 + $0x118] sm:$0xff] }
  0x7a   : > { %1067 = vmatpush.bf16.msra.mxu0 %v2920_v25  ;;  %v2959_v25 = vld [vmem:[#allocation5 + $0x140] sm:$0xff] }
  0x7b   : > { %1080 = vmatpush.bf16.msra.mxu1 %v2928_v29 }
  0x7f   : > { %1081 = vmatpush.bf16.msra.mxu1 %v2927_v43  ;;  %v3004_v43 = vld [vmem:[#allocation5 + $0x2a8] sm:$0xff] }
  0xbe   : > { %v570_v19 = vpop.f32.mrf.mxu0 }
  0xbf   : > { %v584_v20 = vpop.f32.mrf.mxu1  ;;  %v650_v31 = vrot.slane %v570_v19, 7 }
  0xc0   : > { %v651_v32 = vrot.slane %v584_v20, 7  ;;  %v713_v20 = vand.u32 127, %v645_v22 }
  0xc6   : > { %v572_v21 = vpop.f32.mrf.mxu0  ;;  %v598_v26 = vpop.f32.mrf.mxu2 }
  0xc7   : > { %v586_v23 = vpop.f32.mrf.mxu1  ;;  %v612_v28 = vpop.f32.mrf.mxu3  ;;  %v652_v33 = vrot.slane %v572_v21, 7  ;;  %v714_v21 = vmul.u32 2, %v3419_v27  ;;  %v2941_v27 = vld [vmem:[#allocation5 + $0xb0] sm:$0xff] }
  0xc8   : > { %v653_v34 = vrot.slane %v586_v23, 7 }
  0xc9   : > { %v657_v39 = vsel %vm654_vm0, %v652_v33, %v650_v31  ;;  %v655_v48 = vsel %vm654_vm0, %v650_v31, %v652_v33  ;;  %vm715_vm4 = vcmp.eq.s32.totalorder %v713_v20, %v714_v21  ;;  %v2960_v20 = vld [vmem:[#allocation5 + $0x148] sm:$0xff]  ;;  %v2967_v21 = vld [vmem:[#allocation5 + $0x180] sm:$0xff] }
  0xca   : > { %v658_v40 = vsel %vm654_vm0, %v653_v34, %v651_v32  ;;  %v659_v45 = vsel %vm648_vm1, %v657_v39, 0.0  ;;  %v656_v50 = vsel %vm654_vm0, %v651_v32, %v653_v34  ;;  %v2353_v39 = vsel %vm715_vm4, 1.0, %v3291_v38 }
  0xcb   : > { %v660_v46 = vsel %vm648_vm1, %v658_v40, 0.0  ;;  %v663_v57 = vadd.f32 %v659_v45, %v598_v26  ;;  %v2942_v40 = vld [vmem:[#allocation5 + $0xb8] sm:$0xff] }
  0xcc   : > { %v664_v58 = vadd.f32 %v660_v46, %v612_v28  ;;  %v2982_v45 = vld [vmem:[#allocation5 + $0x1f8] sm:$0xff]  ;;  %v2949_v46 = vld [vmem:[#allocation5 + $0xf0] sm:$0xff] }
  0xcd   : > { %1393 = vmatpush.bf16.msrb.mxu1 %v2982_v45  ;;  %v2988_v45 = vld [vmem:[#allocation5 + $0x228] sm:$0xff] }
  0xce   : > { %v600_v47 = vpop.f32.mrf.mxu2 }
  0xcf   : > { %v614_v49 = vpop.f32.mrf.mxu3  ;;  %v665_v63 = vadd.f32 %v655_v48, %v600_v47  ;;  %v2973_v47 = vld [vmem:[#allocation5 + $0x1b0] sm:$0xff] }
  0xd0   : > { %v666_v0 = vadd.f32 %v656_v50, %v614_v49  ;;  %v2981_v48 = vld [vmem:[#allocation5 + $0x1f0] sm:$0xff]  ;;  %v2940_v49 = vld [vmem:[#allocation5 + $0xa8] sm:$0xff] }
  0xd1   : > { %v2948_v50 = vld [vmem:[#allocation5 + $0xe8] sm:$0xff]  ;;  %1394 = vmatpush.bf16.msrb.mxu1 %v2981_v48  ;;  %v2987_v48 = vld [vmem:[#allocation5 + $0x220] sm:$0xff] }
  0xde   : > { %v626_v35 = vpop.f32.mrf.mxu0 }
  0xdf   : > { %v640_v36 = vpop.f32.mrf.mxu1  ;;  %v669_v52 = vrot.slane %v626_v35, 1  ;;  %v2919_v35 = vld [vmem:[#allocation5] sm:$0xff] }
  0xe0   : > { %v670_v59 = vrot.slane %v640_v36, 1  ;;  %1068 = vmatpush.bf16.msra.mxu0 %v2919_v35  ;;  %v2990_v35 = vld [vmem:[#allocation5 + $0x238] sm:$0xff] }
  0xe4   : > { %1380 = vmatpush.bf16.msrb.mxu0 %v2974_v44  ;;  %v3012_v44 = vld [vmem:[#allocation5 + $0x2e8] sm:$0xff] }
  0xe6   : > { %v628_v51 = vpop.f32.mrf.mxu0 }
  0xe7   : > { %v671_v53 = vrot.slane %v628_v51, 1  ;;  %v642_v54 = vpop.f32.mrf.mxu1  ;;  %v2972_v51 = vld [vmem:[#allocation5 + $0x1a8] sm:$0xff] }
  0xe8   : > { %v672_v60 = vrot.slane %v642_v54, 1  ;;  %1381 = vmatpush.bf16.msrb.mxu0 %v2973_v47  ;;  %v2947_v54 = vld [vmem:[#allocation5 + $0xe0] sm:$0xff] }
  0xe9   : > { %v674_v1 = vsel %vm673_vm3, %v669_v52, %v671_v53  ;;  %v676_v2 = vsel %vm673_vm3, %v671_v53, %v669_v52  ;;  %v2980_v52 = vld [vmem:[#allocation5 + $0x1e8] sm:$0xff]  ;;  %v2939_v53 = vld [vmem:[#allocation5 + $0xa0] sm:$0xff] }
  0xea   : > { %v680_v3 = vsel %vm668_vm2, %v676_v2, 0.0  ;;  %v682_v4 = vadd.f32 %v674_v1, %v663_v57  ;;  %v675_v5 = vsel %vm673_vm3, %v670_v59, %v672_v60  ;;  %v677_v6 = vsel %vm673_vm3, %v672_v60, %v670_v59  ;;  %1395 = vmatpush.bf16.msrb.mxu1 %v2980_v52  ;;  %v2938_v57 = vld [vmem:[#allocation5 + $0x98] sm:$0xff]  ;;  %v2936_v1 = vld [vmem:[#allocation5 + $0x88] sm:$0xff]  ;;  %v3011_v47 = vld [vmem:[#allocation5 + $0x2e0] sm:$0xff] }
  0xeb   : > { %v681_v7 = vsel %vm668_vm2, %v677_v6, 0.0  ;;  %v683_v8 = vadd.f32 %v675_v5, %v664_v58  ;;  %v684_v9 = vadd.f32 %v680_v3, %v665_v63  ;;  %v2946_v58 = vld [vmem:[#allocation5 + $0xd8] sm:$0xff]  ;;  %v2969_v63 = vld [vmem:[#allocation5 + $0x190] sm:$0xff]  ;;  %v2944_v2 = vld [vmem:[#allocation5 + $0xc8] sm:$0xff] }
  0xec   : > { %v692_v10 = vadd.f32 %v688_v55, %v682_v4  ;;  %v685_v11 = vadd.f32 %v681_v7, %v666_v0  ;;  %1382 = vmatpush.bf16.msrb.mxu0 %v2972_v51  ;;  %v2970_v59 = vld [vmem:[#allocation5 + $0x198] sm:$0xff]  ;;  %v2977_v0 = vld [vmem:[#allocation5 + $0x1d0] sm:$0xff]  ;;  %v2935_v3 = vld [vmem:[#allocation5 + $0x80] sm:$0xff] }
  0xed   : > { %v694_v14 = vadd.f32 %v688_v55, %v684_v9  ;;  %v693_v15 = vadd.f32 %v689_v56, %v683_v8  ;;  %v2971_v55 = vld [vmem:[#allocation5 + $0x1a0] sm:$0xff]  ;;  %v2978_v60 = vld [vmem:[#allocation5 + $0x1d8] sm:$0xff]  ;;  %v2957_v7 = vld [vmem:[#allocation5 + $0x130] sm:$0xff] }
  0xee   : > { %v696_v16 = vmax.f32 %v692_v10, 0.0  ;;  %v695_v17 = vadd.f32 %v689_v56, %v685_v11  ;;  %v2979_v56 = vld [vmem:[#allocation5 + $0x1e0] sm:$0xff]  ;;  %v2958_v5 = vld [vmem:[#allocation5 + $0x138] sm:$0xff]  ;;  %v2965_v8 = vld [vmem:[#allocation5 + $0x170] sm:$0xff] }
  0xef   : > { %v698_v18 = vmax.f32 %v694_v14, 0.0  ;;  %v697_v19 = vmax.f32 %v693_v15, 0.0  ;;  %1396 = vmatpush.bf16.msrb.mxu1 %v2979_v56  ;;  %v2943_v4 = vld [vmem:[#allocation5 + $0xc0] sm:$0xff]  ;;  %v2966_v6 = vld [vmem:[#allocation5 + $0x178] sm:$0xff]  ;;  %v2956_v9 = vld [vmem:[#allocation5 + $0x128] sm:$0xff] }
  0xf0   : > { %v700_v23 = vrot.slane %v696_v16, 1  ;;  %v699_v24 = vmax.f32 %v695_v17, 0.0  ;;  %1383 = vmatpush.bf16.msrb.mxu0 %v2971_v55  ;;  %v2964_v10 = vld [vmem:[#allocation5 + $0x168] sm:$0xff]  ;;  %v2955_v11 = vld [vmem:[#allocation5 + $0x120] sm:$0xff]  ;;  %v2962_v14 = vld [vmem:[#allocation5 + $0x158] sm:$0xff] }
  0xf1   : > { %v702_v26 = vrot.slane %v698_v18, 1  ;;  %v701_v28 = vrot.slane %v697_v19, 1  ;;  %v2953_v15 = vld [vmem:[#allocation5 + $0x110] sm:$0xff]  ;;  %v2968_v17 = vld [vmem:[#allocation5 + $0x188] sm:$0xff]  ;;  %v3010_v51 = vld [vmem:[#allocation5 + $0x2d8] sm:$0xff] }
  0xf2   : > { %v703_v30 = vrot.slane %v699_v24, 1  ;;  %v2994_v55 = vld [vmem:[#allocation5 + $0x258] sm:$0xff] }
  0xf3   : > { %v706_v31 = vsel %vm673_vm3, %v702_v26, %v700_v23  ;;  %v704_v32 = vsel %vm673_vm3, %v700_v23, %v702_v26  ;;  %1397 = vmatpush.bf16.msrb.mxu1 %v2978_v60  ;;  %v2975_v23 = vld [vmem:[#allocation5 + $0x1c0] sm:$0xff]  ;;  %v2985_v60 = vld [vmem:[#allocation5 + $0x210] sm:$0xff] }
  0xf4   : > { %v710_v33 = vmax.f32 %v698_v18, %v706_v31  ;;  %v707_v22 = vsel %vm673_vm3, %v703_v30, %v701_v28  ;;  %v705_v34 = vsel %vm673_vm3, %v701_v28, %v703_v30  ;;  %v708_v37 = vmax.f32 %v696_v16, %v704_v32  ;;  %1384 = vmatpush.bf16.msrb.mxu0 %v2970_v59  ;;  %v2961_v16 = vld [vmem:[#allocation5 + $0x150] sm:$0xff]  ;;  %v2976_v18 = vld [vmem:[#allocation5 + $0x1c8] sm:$0xff]  ;;  %v3006_v32 = vld [vmem:[#allocation5 + $0x2b8] sm:$0xff] }
  0xf5   : > { %v711_v36 = vmax.f32 %v699_v24, %v707_v22  ;;  %v709_v41 = vmax.f32 %v697_v19, %v705_v34  ;;  %v2952_v19 = vld [vmem:[#allocation5 + $0x108] sm:$0xff]  ;;  %v2951_v24 = vld [vmem:[#allocation5 + $0x100] sm:$0xff]  ;;  %v3009_v59 = vld [vmem:[#allocation5 + $0x2d0] sm:$0xff] }
  0xf6   : > { %736 = vmatpush.msrb.mxu2 %v710_v33  ;;  %v3014_v33 = vld [vmem:[#allocation5 + $0x2f8] sm:$0xff] }
  0xf7   : > { %756 = vmatpush.msrb.mxu3 %v711_v36  ;;  %1398 = vmatpush.bf16.msrb.mxu1 %v2977_v0  ;;  %v2998_v36 = vld [vmem:[#allocation5 + $0x278] sm:$0xff]  ;;  %v2984_v0 = vld [vmem:[#allocation5 + $0x208] sm:$0xff] }
  0xf8   : > { %737 = vmatpush.msrb.mxu2 %v708_v37  ;;  %1385 = vmatpush.bf16.msrb.mxu0 %v2969_v63  ;;  %v3008_v63 = vld [vmem:[#allocation5 + $0x2c8] sm:$0xff] }
  0xf9   : > { %757 = vmatpush.msrb.mxu3 %v709_v41  ;;  %2354 = vmatmul.msk.f32.vlgmr.msrb.gmra.mxu2 %vm718_vm5, %v2353_v39  ;;  %v2989_v41 = vld [vmem:[#allocation5 + $0x230] sm:$0xff] }
  0xfa   : > { %2355 = vmatmul.msk.f32.vlgmr.msrb.gmra.mxu3 %vm718_vm5, %v2353_v39  ;;  %937 = vmatpush.bf16.msra.mxu2 %v2942_v40  ;;  %v3005_v39 = vld [vmem:[#allocation5 + $0x2b0] sm:$0xff] }
  0xfb   : > { %950 = vmatpush.bf16.msra.mxu3 %v2950_v42  ;;  %1399 = vmatpush.bf16.msrb.mxu1 %v2976_v18  ;;  %v3013_v40 = vld [vmem:[#allocation5 + $0x2f0] sm:$0xff]  ;;  %v3036_v18 = vld [vmem:[#allocation5 + $0x3a8] sm:$0xff] }
  0xfc   : > { %1386 = vmatpush.bf16.msrb.mxu0 %v2968_v17  ;;  %v2997_v42 = vld [vmem:[#allocation5 + $0x270] sm:$0xff] }
  0xfe   : > { %938 = vmatpush.bf16.msra.mxu2 %v2941_v27  ;;  %v2996_v27 = vld [vmem:[#allocation5 + $0x268] sm:$0xff] }
  0xff   : > { %951 = vmatpush.bf16.msra.mxu3 %v2949_v46  ;;  %1400 = vmatpush.bf16.msrb.mxu1 %v2975_v23  ;;  %v3003_v46 = vld [vmem:[#allocation5 + $0x2a0] sm:$0xff] }
 0x100   : > { %1387 = vmatpush.bf16.msrb.mxu0 %v2967_v21  ;;  %v3028_v21 = vld [vmem:[#allocation5 + $0x368] sm:$0xff]  ;;  %v3035_v23 = vld [vmem:[#allocation5 + $0x3a0] sm:$0xff] }
 0x102   : > { %939 = vmatpush.bf16.msra.mxu2 %v2940_v49  ;;  %v2995_v49 = vld [vmem:[#allocation5 + $0x260] sm:$0xff] }
 0x103   : > { %952 = vmatpush.bf16.msra.mxu3 %v2948_v50  ;;  %v3002_v50 = vld [vmem:[#allocation5 + $0x298] sm:$0xff] }
 0x106   : > { %940 = vmatpush.bf16.msra.mxu2 %v2939_v53 }
 0x107   : > { %953 = vmatpush.bf16.msra.mxu3 %v2947_v54  ;;  %v2986_v54 = vld [vmem:[#allocation5 + $0x218] sm:$0xff] }
 0x10a   : > { %941 = vmatpush.bf16.msra.mxu2 %v2938_v57 }
 0x10b   : > { %954 = vmatpush.bf16.msra.mxu3 %v2946_v58  ;;  %v3001_v58 = vld [vmem:[#allocation5 + $0x290] sm:$0xff] }
 0x10e   : > { %942 = vmatpush.bf16.msra.mxu2 %v2937_v61  ;;  %v2993_v61 = vld [vmem:[#allocation5 + $0x250] sm:$0xff] }
 0x10f   : > { %955 = vmatpush.bf16.msra.mxu3 %v2945_v62  ;;  %v3000_v62 = vld [vmem:[#allocation5 + $0x288] sm:$0xff] }
 0x112   : > { %943 = vmatpush.bf16.msra.mxu2 %v2936_v1  ;;  %v2992_v1 = vld [vmem:[#allocation5 + $0x248] sm:$0xff] }
 0x113   : > { %956 = vmatpush.bf16.msra.mxu3 %v2944_v2  ;;  %v2999_v2 = vld [vmem:[#allocation5 + $0x280] sm:$0xff] }
 0x116   : > { %944 = vmatpush.bf16.msra.mxu2 %v2935_v3  ;;  %v3007_v3 = vld [vmem:[#allocation5 + $0x2c0] sm:$0xff] }
 0x117   : > { %957 = vmatpush.bf16.msra.mxu3 %v2943_v4  ;;  %v3038_v4 = vld [vmem:[#allocation5 + $0x3b8] sm:$0xff] }
 0x11a   : > { %1220 = vmatpush.bf16.msrb.mxu2 %v2958_v5  ;;  %v3046_v5 = vld [vmem:[#allocation5 + $0x3f8] sm:$0xff] }
 0x11b   : > { %1233 = vmatpush.bf16.msrb.mxu3 %v2966_v6  ;;  %v2983_v6 = vld [vmem:[#allocation5 + $0x200] sm:$0xff] }
 0x11e   : > { %1221 = vmatpush.bf16.msrb.mxu2 %v2957_v7  ;;  %v2991_v7 = vld [vmem:[#allocation5 + $0x240] sm:$0xff] }
 0x11f   : > { %1234 = vmatpush.bf16.msrb.mxu3 %v2965_v8  ;;  %v3022_v8 = vld [vmem:[#allocation5 + $0x338] sm:$0xff] }
 0x122   : > { %1222 = vmatpush.bf16.msrb.mxu2 %v2956_v9  ;;  %v3030_v9 = vld [vmem:[#allocation5 + $0x378] sm:$0xff] }
 0x123   : > { %1235 = vmatpush.bf16.msrb.mxu3 %v2964_v10  ;;  %v3037_v10 = vld [vmem:[#allocation5 + $0x3b0] sm:$0xff] }
 0x126   : > { %1223 = vmatpush.bf16.msrb.mxu2 %v2955_v11  ;;  %v3045_v11 = vld [vmem:[#allocation5 + $0x3f0] sm:$0xff] }
 0x127   : > { %1236 = vmatpush.bf16.msrb.mxu3 %v2963_v12 }
 0x12a   : > { %1224 = vmatpush.bf16.msrb.mxu2 %v2954_v13 }
 0x12b   : > { %1237 = vmatpush.bf16.msrb.mxu3 %v2962_v14  ;;  %v3021_v14 = vld [vmem:[#allocation5 + $0x330] sm:$0xff] }
 0x12e   : > { %1225 = vmatpush.bf16.msrb.mxu2 %v2953_v15  ;;  %v3029_v15 = vld [vmem:[#allocation5 + $0x370] sm:$0xff] }
 0x12f   : > { %1238 = vmatpush.bf16.msrb.mxu3 %v2961_v16 }
 0x132   : > { %1226 = vmatpush.bf16.msrb.mxu2 %v2952_v19  ;;  %v3044_v19 = vld [vmem:[#allocation5 + $0x3e8] sm:$0xff] }
 0x133   : > { %1239 = vmatpush.bf16.msrb.mxu3 %v2960_v20  ;;  %v3020_v20 = vld [vmem:[#allocation5 + $0x328] sm:$0xff] }
 0x136   : > { %1227 = vmatpush.bf16.msrb.mxu2 %v2951_v24  ;;  %v3043_v24 = vld [vmem:[#allocation5 + $0x3e0] sm:$0xff] }
 0x137   : > { %1240 = vmatpush.bf16.msrb.mxu3 %v2959_v25  ;;  %v3019_v25 = vld [vmem:[#allocation5 + $0x320] sm:$0xff] }
 0x17c   : > { %v739_v26 = vpop.f32.mrf.mxu2 }
 0x17d   : > { %v759_v28 = vpop.f32.mrf.mxu3 }
 0x17e   : > { %v762_v29 = vpack.c.bf16 %v759_v28, %v739_v26  ;;  %v3027_v26 = vld [vmem:[#allocation5 + $0x360] sm:$0xff]  ;;  %v3034_v28 = vld [vmem:[#allocation5 + $0x398] sm:$0xff] }
 0x180   : > { %v829_v30 = vunpack.c.l.b16 %v762_v29  ;;  %v830_v31 = vunpack.c.h.b16 %v762_v29  ;;  %v3042_v29 = vld [vmem:[#allocation5 + $0x3d8] sm:$0xff] }
 0x182   : > { %v3456_v22 = vpack.c.b16 %v829_v30, %v829_v30  ;;  %v3458_v34 = vpack.c.b16 %v830_v31, %v830_v31  ;;  %v3018_v30 = vld [vmem:[#allocation5 + $0x318] sm:$0xff] }
 0x183   : > { %v3026_v31 = vld [vmem:[#allocation5 + $0x358] sm:$0xff] }
 0x184   : > { %1069 = vmatmul.bf16.vlgmr.msra.gmra.mxu0 %v3456_v22  ;;  %1082 = vmatmul.bf16.vlgmr.msra.gmra.mxu1 %v3458_v34  ;;  %v3463_v37 = vshrl.u32 %v3456_v22, 16  ;;  %v3466_v38 = vshrl.u32 %v3458_v34, 16  ;;  %v1120_v56 = vrot.slane %v3456_v22, 1  ;;  %v1121_v57 = vrot.slane %v3458_v34, 1 }
 0x185   : > { %1700 = vmatpush.bf16.msra.mxu0 %v3006_v32  ;;  %1713 = vmatpush.bf16.msra.mxu1 %v3014_v33  ;;  %v1440_v16 = vrot.slane %v3456_v22, 2  ;;  %v1441_v17 = vrot.slane %v3458_v34, 2  ;;  %v3033_v32 = vld [vmem:[#allocation5 + $0x390] sm:$0xff] }
 0x186   : > { %945 = vmatmul.bf16.vlgmr.msra.gmra.mxu2 %v3463_v37  ;;  %958 = vmatmul.bf16.vlgmr.msra.gmra.mxu3 %v3466_v38  ;;  %v1280_v52 = vrot.slane %v3463_v37, 1  ;;  %v1281_v53 = vrot.slane %v3466_v38, 1  ;;  %v1600_v12 = vrot.slane %v3463_v37, 2  ;;  %v1601_v13 = vrot.slane %v3466_v38, 2  ;;  %v3041_v33 = vld [vmem:[#allocation5 + $0x3d0] sm:$0xff] }
 0x187   : > { %1540 = vmatpush.bf16.msra.mxu2 %v2990_v35  ;;  %1553 = vmatpush.bf16.msra.mxu3 %v2998_v36  ;;  %v3017_v35 = vld [vmem:[#allocation5 + $0x310] sm:$0xff] }
 0x188   : > { %v3025_v36 = vld [vmem:[#allocation5 + $0x350] sm:$0xff] }
 0x189   : > { %1701 = vmatpush.bf16.msra.mxu0 %v3005_v39  ;;  %1714 = vmatpush.bf16.msra.mxu1 %v3013_v40  ;;  %v3032_v39 = vld [vmem:[#allocation5 + $0x388] sm:$0xff] }
 0x18a   : > { %v3040_v40 = vld [vmem:[#allocation5 + $0x3c8] sm:$0xff] }
 0x18b   : > { %1541 = vmatpush.bf16.msra.mxu2 %v2989_v41  ;;  %1554 = vmatpush.bf16.msra.mxu3 %v2997_v42  ;;  %v3016_v41 = vld [vmem:[#allocation5 + $0x308] sm:$0xff] }
 0x18c   : > { %v3024_v42 = vld [vmem:[#allocation5 + $0x348] sm:$0xff] }
 0x18d   : > { %1702 = vmatpush.bf16.msra.mxu0 %v3004_v43  ;;  %1715 = vmatpush.bf16.msra.mxu1 %v3012_v44  ;;  %v3031_v43 = vld [vmem:[#allocation5 + $0x380] sm:$0xff] }
 0x18e   : > { %v3039_v44 = vld [vmem:[#allocation5 + $0x3c0] sm:$0xff] }
 0x18f   : > { %1542 = vmatpush.bf16.msra.mxu2 %v2988_v45  ;;  %1555 = vmatpush.bf16.msra.mxu3 %v2996_v27  ;;  %v3015_v45 = vld [vmem:[#allocation5 + $0x300] sm:$0xff] }
 0x190   : > { %v3023_v27 = vld [vmem:[#allocation5 + $0x340] sm:$0xff] }
 0x191   : > { %1703 = vmatpush.bf16.msra.mxu0 %v3003_v46  ;;  %1716 = vmatpush.bf16.msra.mxu1 %v3011_v47  ;;  %v1920_v46 = vrot.slane %v3463_v37, 3  ;;  %v1921_v47 = vrot.slane %v3466_v38, 3 }
 0x193   : > { %1543 = vmatpush.bf16.msra.mxu2 %v2987_v48  ;;  %1556 = vmatpush.bf16.msra.mxu3 %v2995_v49  ;;  %v1760_v48 = vrot.slane %v3456_v22, 3  ;;  %v1761_v49 = vrot.slane %v3458_v34, 3 }
 0x194   : > { %1388 = vmatmul.bf16.vlgmr.msrb.gmra.mxu0 %v1280_v52  ;;  %1401 = vmatmul.bf16.vlgmr.msrb.gmra.mxu1 %v1281_v53 }
 0x195   : > { %1704 = vmatpush.bf16.msra.mxu0 %v3002_v50  ;;  %1717 = vmatpush.bf16.msra.mxu1 %v3010_v51 }
 0x196   : > { %1228 = vmatmul.bf16.vlgmr.msrb.gmra.mxu2 %v1120_v56  ;;  %1241 = vmatmul.bf16.vlgmr.msrb.gmra.mxu3 %v1121_v57 }
 0x197   : > { %1544 = vmatpush.bf16.msra.mxu2 %v2986_v54  ;;  %1557 = vmatpush.bf16.msra.mxu3 %v2994_v55 }
 0x199   : > { %1705 = vmatpush.bf16.msra.mxu0 %v3001_v58  ;;  %1718 = vmatpush.bf16.msra.mxu1 %v3009_v59 }
 0x19b   : > { %1545 = vmatpush.bf16.msra.mxu2 %v2985_v60  ;;  %1558 = vmatpush.bf16.msra.mxu3 %v2993_v61 }
 0x19d   : > { %1706 = vmatpush.bf16.msra.mxu0 %v3000_v62  ;;  %1719 = vmatpush.bf16.msra.mxu1 %v3008_v63 }
 0x19f   : > { %1546 = vmatpush.bf16.msra.mxu2 %v2984_v0  ;;  %1559 = vmatpush.bf16.msra.mxu3 %v2992_v1 }
 0x1a1   : > { %1707 = vmatpush.bf16.msra.mxu0 %v2999_v2  ;;  %1720 = vmatpush.bf16.msra.mxu1 %v3007_v3 }
 0x1a3   : > { %1547 = vmatpush.bf16.msra.mxu2 %v2983_v6  ;;  %1560 = vmatpush.bf16.msra.mxu3 %v2991_v7 }
 0x1a4   : > { %1708 = vmatmul.bf16.vlgmr.msra.gmra.mxu0 %v1600_v12  ;;  %1721 = vmatmul.bf16.vlgmr.msra.gmra.mxu1 %v1601_v13 }
 0x1a5   : > { %2020 = vmatpush.bf16.msrb.mxu0 %v3038_v4  ;;  %2033 = vmatpush.bf16.msrb.mxu1 %v3046_v5 }
 0x1a6   : > { %1548 = vmatmul.bf16.vlgmr.msra.gmra.mxu2 %v1440_v16  ;;  %1561 = vmatmul.bf16.vlgmr.msra.gmra.mxu3 %v1441_v17 }
 0x1a7   : > { %1860 = vmatpush.bf16.msrb.mxu2 %v3022_v8  ;;  %1873 = vmatpush.bf16.msrb.mxu3 %v3030_v9 }
 0x1a9   : > { %2021 = vmatpush.bf16.msrb.mxu0 %v3037_v10  ;;  %2034 = vmatpush.bf16.msrb.mxu1 %v3045_v11 }
 0x1ab   : > { %1861 = vmatpush.bf16.msrb.mxu2 %v3021_v14  ;;  %1874 = vmatpush.bf16.msrb.mxu3 %v3029_v15 }
 0x1ad   : > { %2022 = vmatpush.bf16.msrb.mxu0 %v3036_v18  ;;  %2035 = vmatpush.bf16.msrb.mxu1 %v3044_v19 }
 0x1af   : > { %1862 = vmatpush.bf16.msrb.mxu2 %v3020_v20  ;;  %1875 = vmatpush.bf16.msrb.mxu3 %v3028_v21 }
 0x1b1   : > { %2023 = vmatpush.bf16.msrb.mxu0 %v3035_v23  ;;  %2036 = vmatpush.bf16.msrb.mxu1 %v3043_v24 }
 0x1b3   : > { %1863 = vmatpush.bf16.msrb.mxu2 %v3019_v25  ;;  %1876 = vmatpush.bf16.msrb.mxu3 %v3027_v26 }
 0x1b5   : > { %2024 = vmatpush.bf16.msrb.mxu0 %v3034_v28  ;;  %2037 = vmatpush.bf16.msrb.mxu1 %v3042_v29  ;;  %v2047_v28 = vld [vmem:[#allocation7] sm:$0x1] }
 0x1b7   : > { %1864 = vmatpush.bf16.msrb.mxu2 %v3018_v30  ;;  %1877 = vmatpush.bf16.msrb.mxu3 %v3026_v31 }
 0x1b9   : > { %2025 = vmatpush.bf16.msrb.mxu0 %v3033_v32  ;;  %2038 = vmatpush.bf16.msrb.mxu1 %v3041_v33 }
 0x1bb   : > { %1865 = vmatpush.bf16.msrb.mxu2 %v3017_v35  ;;  %1878 = vmatpush.bf16.msrb.mxu3 %v3025_v36 }
 0x1bd   : > { %2026 = vmatpush.bf16.msrb.mxu0 %v3032_v39  ;;  %2039 = vmatpush.bf16.msrb.mxu1 %v3040_v40 }
 0x1bf   : > { %1866 = vmatpush.bf16.msrb.mxu2 %v3016_v41  ;;  %1879 = vmatpush.bf16.msrb.mxu3 %v3024_v42 }
 0x1c1   : > { %2027 = vmatpush.bf16.msrb.mxu0 %v3031_v43  ;;  %2040 = vmatpush.bf16.msrb.mxu1 %v3039_v44 }
 0x1c3   : > { %1867 = vmatpush.bf16.msrb.mxu2 %v3015_v45  ;;  %1880 = vmatpush.bf16.msrb.mxu3 %v3023_v27 }
 0x1c4   : > { %2028 = vmatmul.bf16.vlgmr.msrb.gmra.mxu0 %v1920_v46  ;;  %2041 = vmatmul.bf16.vlgmr.msrb.gmra.mxu1 %v1921_v47 }
 0x1c6   : > { %1868 = vmatmul.bf16.vlgmr.msrb.gmra.mxu2 %v1760_v48  ;;  %1881 = vmatmul.bf16.vlgmr.msrb.gmra.mxu3 %v1761_v49 }
 0x201   : > { %v1070_v50 = vpop.f32.mrf.mxu0  ;;  %v1083_v51 = vpop.f32.mrf.mxu1 }
 0x209   : > { %v946_v52 = vpop.f32.mrf.mxu2  ;;  %v959_v53 = vpop.f32.mrf.mxu3 }
 0x20a   : > { %v1072_v54 = vpop.f32.mrf.mxu0  ;;  %v1085_v55 = vpop.f32.mrf.mxu1  ;;  %v960_v6 = vadd.f32 %v959_v53, %v946_v52 }
 0x20c   : > { %v1071_v7 = vadd.f32 %v1070_v50, %v960_v6 }
 0x20e   : > { %v1084_v9 = vadd.f32 %v1083_v51, %v1071_v7 }
 0x211   : > { %v948_v56 = vpop.f32.mrf.mxu2  ;;  %v961_v37 = vpop.f32.mrf.mxu3 }
 0x212   : > { %v1389_v57 = vpop.f32.mrf.mxu0  ;;  %v1402_v38 = vpop.f32.mrf.mxu1 }
 0x213   : > { %v1403_v13 = vadd.f32 %v1402_v38, %v1389_v57 }
 0x219   : > { %v1229_v58 = vpop.f32.mrf.mxu2  ;;  %v1242_v59 = vpop.f32.mrf.mxu3 }
 0x21a   : > { %v1391_v60 = vpop.f32.mrf.mxu0  ;;  %v1404_v61 = vpop.f32.mrf.mxu1  ;;  %v1243_v8 = vadd.f32 %v1242_v59, %v1229_v58 }
 0x21c   : > { %v1246_v10 = vadd.f32 %v1243_v8, %v1084_v9 }
 0x21e   : > { %v1406_v15 = vadd.f32 %v1403_v13, %v1246_v10 }
 0x221   : > { %v1231_v62 = vpop.f32.mrf.mxu2  ;;  %v1244_v22 = vpop.f32.mrf.mxu3 }
 0x222   : > { %v1709_v63 = vpop.f32.mrf.mxu0  ;;  %v1722_v34 = vpop.f32.mrf.mxu1 }
 0x223   : > { %v1723_v17 = vadd.f32 %v1722_v34, %v1709_v63 }
 0x229   : > { %v1549_v0 = vpop.f32.mrf.mxu2  ;;  %v1562_v1 = vpop.f32.mrf.mxu3 }
 0x22a   : > { %v1711_v2 = vpop.f32.mrf.mxu0  ;;  %v1724_v3 = vpop.f32.mrf.mxu1  ;;  %v1563_v14 = vadd.f32 %v1562_v1, %v1549_v0 }
 0x22c   : > { %v1566_v16 = vadd.f32 %v1563_v14, %v1406_v15 }
 0x22e   : > { %v1726_v20 = vadd.f32 %v1723_v17, %v1566_v16 }
 0x231   : > { %v1551_v4 = vpop.f32.mrf.mxu2  ;;  %v1564_v5 = vpop.f32.mrf.mxu3 }
 0x241   : > { %v2029_v11 = vpop.f32.mrf.mxu0  ;;  %v2042_v12 = vpop.f32.mrf.mxu1 }
 0x242   : > { %v2043_v25 = vadd.f32 %v2042_v12, %v2029_v11 }
 0x249   : > { %v1869_v18 = vpop.f32.mrf.mxu2  ;;  %v1882_v19 = vpop.f32.mrf.mxu3 }
 0x24a   : > { %v1883_v21 = vadd.f32 %v1882_v19, %v1869_v18  ;;  %v2031_v23 = vpop.f32.mrf.mxu0  ;;  %v2044_v24 = vpop.f32.mrf.mxu1 }
 0x24c   : > { %v1886_v26 = vadd.f32 %v1883_v21, %v1726_v20 }
 0x24e   : > { %v2046_v29 = vadd.f32 %v2043_v25, %v1886_v26 }
 0x250   : > { %v2048_v30 = vadd.f32 %v2047_v28, %v2046_v29 }
 0x251   : > { %v1871_v31 = vpop.f32.mrf.mxu2  ;;  %v1884_v32 = vpop.f32.mrf.mxu3 }
 0x252   : > { %2049 = vst [vmem:[%s264_s6] sm:$0x1] %v2048_v30 }
 0x253   : > { %3239 = shalt.err (!%p3236_p8)
}
 0x254   : > { %3059 = dma.vmem_to_hbm [thread:$0]  (%p3360_p5), %s2062_s7, 16, %s2064_s9, %s2051_s12  }
 0x255 PF: > { %p3081_p9 = scmp.ge.s32.totalorder %s3282_s21, 2  ;;  %s2075_s15 = sand.u32 1, %s3270_s18  }
 0x256   : > { %s2076_s16 = scalar_lea.sflag [#allocation4], %s2075_s15 }
 0x257   : > { %p3072_p10 = pnand %p3081_p9, %p3364_p6 }
 0x259   : > { %p3073_p11 = pneg %p3072_p10 }
 0x25b   : > { %3265 = dma.done.wait (%p3073_p11), %s2076_s16, 16  }
 0x25c   : > { %3267 = vsyncadd (%p3073_p11), %s2076_s16, 4294967280  ;;  %p17_p12 = scmp.ge.s32.totalorder %s3347_s24, 4   ;;  %s3524_s18 = smov %s3274_s19 }
 0x25d   : > { %s3525_s19 = smov %s3278_s20  ;;  %s3526_s20 = smov %s3358_s27 }
 0x25e   : > { %s3527_s21 = smov %s3347_s24  ;;  %19 = sbr.rel (!%p17_p12) target bundleno = 5 (0x5), region = 95 }
 0x263   :  { %2081 = vsyncpa [#allocation3], 1 }
 0x264   :  { %2083 = vsyncpa [#allocation3 + $0x1], 1 }
 0x265   :  { %2084 = vsyncpa [#allocation6], 1 }
 0x266   :  { %2085 = vsyncpa [#allocation4], 1 }
 0x267   :  { %2087 = vsyncpa [#allocation4 + $0x1], 1 }

</bundles_post_ra>
